<compile_context>
chip_gen: v6e
topology: v6e:2x2x1
jax: 0.10.0
libtpu: 0.0.40
codegen_flags: <defaults>
</compile_context>

<pallas_src>
import jax
import jax.numpy as jnp
from jax.experimental import pallas as pl
from jax.experimental.pallas import tpu as pltpu

N1, N2 = 18, 18                        # 18 + 18 = 36 channels feeding Conv1d(36, 1, 1)
N_CH = N1 + N2
D_PAY, D_HDR = 76, 64
D_CAT = 144                            # 76 + 64 = 140, padded to 144 (zeros)
D_HID, D_OUT = 128, 2
_NEG = -1e30                           # "minus infinity" bias for padded logit lanes

assert N1 == N2, "branch fusion assumes the two branches have equal channel counts"


def _round_up(x, m):
    return (x + m - 1) // m * m


def _client_local_loss_kernel(x_ref, w_ref, b_ref, wc_ref, bc_ref,
                              wf_ref, bf_ref, o_ref, acc_ref):
    # x_ref  : (18, TB, 144)   channel-major, features = [pay(76) | hdr(64) | pad(4)]
    # w_ref  : (144, 256)      block-diagonal [[Wp, 0], [0, Wh]]
    # b_ref  : (1, 256) f32    [bp | bh]
    # wc_ref : (36,)   f32 SMEM   conv weights (pay channels [0:18], hdr [18:36])
    # bc_ref : (1,)    f32 SMEM   conv bias
    # wf_ref : (128, 128) f32  final fc padded to 128 lanes (zero weight on pads)
    # bf_ref : (1, 128)  f32   final fc bias, -1e30 on the 126 padded lanes
    # o_ref  : (TB, 128) f32   log-probs (only first 2 lanes meaningful)
    # acc_ref: (TB, 128) f32   VMEM scratch (conv accumulator)

    def channel(n):
        # One fused matmul per channel: both branches at once (N=256 on the MXU).
        h = jnp.dot(x_ref[n], w_ref[...],
                    preferred_element_type=jnp.float32) + b_ref[...]     # (TB, 256) f32
        h = jnp.maximum(h, 0.0)
        # Split on the 128-lane tile boundary; fold conv scale immediately
        # (one accumulator RMW per channel, nothing large kept live).
        return wc_ref[n] * h[:, :D_HID] + wc_ref[N1 + n] * h[:, D_HID:]  # (TB, 128)

    # Channel 0 folds the conv bias and replaces the zero-init pass.
    acc_ref[...] = channel(0) + bc_ref[0]
    for n in range(1, N1):
        acc_ref[...] = acc_ref[...] + channel(n)

    # Conv ReLU, padded head matmul, log_softmax.
    # Padded lanes have zero weight and -1e30 bias, so exp() underflows to exactly 0
    # and the 128-lane softmax equals the 2-class softmax.
    c = jnp.maximum(acc_ref[...], 0.0)                                    # (TB, 128)
    logits = jnp.dot(c, wf_ref[...], preferred_element_type=jnp.float32) + bf_ref[...]
    m = jnp.max(logits, axis=-1, keepdims=True)
    z = logits - m
    lse = jnp.log(jnp.sum(jnp.exp(z), axis=-1, keepdims=True))
    o_ref[...] = z - lse                                                  # (TB, 128)


def client_local_loss(x1, x2, params, *, tb=1024, compute_dtype=jnp.bfloat16):
    """x1: (B, 18, 76), x2: (B, 18, 64) -> (B, 2) f32 log-probs."""
    B = x1.shape[0]
    wp, bp, wh, bh, wc, bc, wf, bf = params

    # Batch tile: multiple of 8 sublanes, no larger than the (padded) batch.
    tb = max(8, min(tb, _round_up(B, 8)))
    # If the whole batch fits one tile, split it in two so both v7x TensorCores
    # (grid "parallel" axis) get work; costs only one extra ~0.35us pipeline step.
    if _round_up(B, tb) // tb == 1 and tb >= 16:
        tb = _round_up(tb // 2, 8)
    b_pad = _round_up(B, tb)
    n_tiles = b_pad // tb

    # Channel-major, feature-concatenated input: (18, b_pad, 144).
    # transpose + astype + pad/set fuse into a single XLA copy.
    x_cat = jnp.zeros((N1, b_pad, D_CAT), compute_dtype)
    x_cat = x_cat.at[:, :B, :D_PAY].set(
        jnp.transpose(x1, (1, 0, 2)).astype(compute_dtype))
    x_cat = x_cat.at[:, :B, D_PAY:D_PAY + D_HDR].set(
        jnp.transpose(x2, (1, 0, 2)).astype(compute_dtype))
    # TODO(synk): if the upstream model can emit channel-major (18, B, feat)
    # activations directly, consume them here without this transpose copy.

    # Block-diagonal fused branch weight (144, 256) and concatenated bias (1, 256).
    w_cat = jnp.zeros((D_CAT, 2 * D_HID), compute_dtype)
    w_cat = w_cat.at[:D_PAY, :D_HID].set(wp.astype(compute_dtype))
    w_cat = w_cat.at[D_PAY:D_PAY + D_HDR, D_HID:].set(wh.astype(compute_dtype))
    b_cat = jnp.concatenate([bp.astype(jnp.float32).reshape(1, D_HID),
                             bh.astype(jnp.float32).reshape(1, D_HID)], axis=1)

    wc32 = wc.astype(jnp.float32).reshape(N_CH)                # SMEM scalars
    bc32 = bc.astype(jnp.float32).reshape(1)                   # SMEM scalar

    # Lane-dense head: pad fc to 128 output lanes (zero weight, -1e30 bias).
    wf_pad = jnp.zeros((D_HID, D_HID), jnp.float32).at[:, :D_OUT].set(
        wf.astype(jnp.float32))
    bf_pad = jnp.concatenate(
        [bf.astype(jnp.float32).reshape(1, D_OUT),
         jnp.full((1, D_HID - D_OUT), _NEG, jnp.float32)], axis=1)

    smem = pl.BlockSpec(memory_space=pltpu.MemorySpace.SMEM)

    def rep(shape):   # whole small 2-D parameter, replicated across grid steps
        return pl.BlockSpec(shape, lambda i: (0, 0))

    out = pl.pallas_call(
        _client_local_loss_kernel,
        out_shape=jax.ShapeDtypeStruct((b_pad, D_HID), jnp.float32),
        grid=(n_tiles,),
        in_specs=[
            pl.BlockSpec((N1, tb, D_CAT), lambda i: (0, i, 0)),
            rep((D_CAT, 2 * D_HID)), rep((1, 2 * D_HID)),
            smem, smem,
            rep((D_HID, D_HID)), rep((1, D_HID)),
        ],
        out_specs=pl.BlockSpec((tb, D_HID), lambda i: (i, 0)),
        scratch_shapes=[pltpu.VMEM((tb, D_HID), jnp.float32)],
        compiler_params=pltpu.CompilerParams(
            dimension_semantics=("parallel",),
            # tb=1024 bf16 ~= 12 MiB, f32 ~= 22 MiB (double-buffered); 48 MiB covers
            # both and tb=2048 bf16, and stays under v7x's 64 MiB physical VMEM.
            vmem_limit_bytes=48 * 1024 * 1024),
    )(x_cat, w_cat, b_cat, wc32, bc32, wf_pad, bf_pad)

    # torch .squeeze() would give shape (2,) when B == 1 (and the torch module's
    # log_softmax(dim=1) would then fail); we always return (B, 2).
    return out[:B, :D_OUT]


def _reference(x1, x2, params):
    """Pure-JAX reference mirroring the PyTorch forward."""
    wp, bp, wh, bh, wc, bc, wf, bf = params
    h1 = jax.nn.relu(x1 @ wp + bp)                       # (B, 18, 128)
    h2 = jax.nn.relu(x2 @ wh + bh)                       # (B, 18, 128)
    h = jnp.concatenate([h1, h2], axis=1)                # (B, 36, 128) == torch.cat(.., 1)
    c = jnp.einsum("c,bcl->bl", wc, h) + bc[0]           # Conv1d(36, 1, 1) -> (B, 128)
    c = jax.nn.relu(c)
    logits = c @ wf + bf                                 # (B, 2)
    return jax.nn.log_softmax(logits, axis=1)


if __name__ == "__main__":
    key = jax.random.PRNGKey(0)
    ks = jax.random.split(key, 12)

    def unif(k, shape, fan_in):
        bound = 1.0 / jnp.sqrt(jnp.float32(fan_in))
        return jax.random.uniform(k, shape, jnp.float32, -bound, bound)

    # Deterministic synthetic parameters (shapes from the module's __init__).
    wp = unif(ks[0], (D_PAY, D_HID), D_PAY)    # fc_pay.weight.T
    bp = unif(ks[1], (1, D_HID), D_PAY)        # fc_pay.bias
    wh = unif(ks[2], (D_HDR, D_HID), D_HDR)    # fc_hdr.weight.T
    bh = unif(ks[3], (1, D_HID), D_HDR)        # fc_hdr.bias
    wc = unif(ks[4], (N_CH,), N_CH)            # conv.weight.reshape(36)
    bc = unif(ks[5], (1,), N_CH)               # conv.bias
    wf = unif(ks[6], (D_HID, D_OUT), D_HID)    # fc.weight.T
    bf = unif(ks[7], (1, D_OUT), D_HID)        # fc.bias
    params = (wp, bp, wh, bh, wc, bc, wf, bf)

    # Small test batch.
    B = 2
    x1 = jax.random.normal(ks[8], (B, N1, D_PAY), jnp.float32)   # input1
    x2 = jax.random.normal(ks[9], (B, N2, D_HDR), jnp.float32)   # input2
    expect = _reference(x1, x2, params)

    # Default (bf16 inputs / branch weights, f32 accumulation + head).
    out_bf16 = client_local_loss(x1, x2, params)
    jax.block_until_ready(out_bf16)
    assert out_bf16.shape == (B, D_OUT)
    assert jnp.allclose(out_bf16, expect, atol=5e-2, rtol=5e-2), \
        float(jnp.max(jnp.abs(out_bf16 - expect)))

    # Full-f32 path (tight tolerance).
    out_f32 = client_local_loss(x1, x2, params, compute_dtype=jnp.float32)
    jax.block_until_ready(out_f32)
    assert jnp.allclose(out_f32, expect, atol=1e-3, rtol=1e-3), \
        float(jnp.max(jnp.abs(out_f32 - expect)))

    # Padding + multi-tile grid path (B not a multiple of tb).
    B2 = 33
    x1b = jax.random.normal(ks[10], (B2, N1, D_PAY), jnp.float32)
    x2b = jax.random.normal(ks[11], (B2, N2, D_HDR), jnp.float32)
    out_b = client_local_loss(x1b, x2b, params, tb=16, compute_dtype=jnp.float32)
    jax.block_until_ready(out_b)
    expect_b = _reference(x1b, x2b, params)
    assert out_b.shape == (B2, D_OUT)
    assert jnp.allclose(out_b, expect_b, atol=1e-3, rtol=1e-3), \
        float(jnp.max(jnp.abs(out_b - expect_b)))

    print("KERNEL_OK")
</pallas_src>

<mosaic_0001>
module attributes {stable_mosaic.version = 11 : i64} {
  func.func @_client_local_loss_kernel(%arg0: i32, %arg1: memref<18x8x144xbf16, #tpu.memory_space<vmem>>, %arg2: memref<144x256xbf16, #tpu.memory_space<vmem>>, %arg3: memref<1x256xf32, #tpu.memory_space<vmem>>, %arg4: memref<36xf32, #tpu.memory_space<smem>>, %arg5: memref<1xf32, #tpu.memory_space<smem>>, %arg6: memref<128x128xf32, #tpu.memory_space<vmem>>, %arg7: memref<1x128xf32, #tpu.memory_space<vmem>>, %arg8: memref<8x128xf32, #tpu.memory_space<vmem>>, %arg9: memref<8x128xf32, #tpu.memory_space<vmem>>) attributes {dimension_semantics = [#tpu.dimension_semantics<parallel>], iteration_bounds = array<i64: 1>, scalar_prefetch = 0 : i64, scratch_operands = 1 : i64, tpu.core_type = #tpu.core_type<tc>, window_params = [{transform_indices = @transform_0, window_bounds = array<i64: 18, 8, 144>}, {pipeline_mode = #tpu.pipeline_mode<synchronous>, transform_indices = @transform_1, window_bounds = array<i64: 144, 256>}, {pipeline_mode = #tpu.pipeline_mode<synchronous>, transform_indices = @transform_2, window_bounds = array<i64: 1, 256>}, {transform_indices = @transform_3, window_bounds = array<i64: 36>}, {transform_indices = @transform_4, window_bounds = array<i64: 1>}, {pipeline_mode = #tpu.pipeline_mode<synchronous>, transform_indices = @transform_5, window_bounds = array<i64: 128, 128>}, {pipeline_mode = #tpu.pipeline_mode<synchronous>, transform_indices = @transform_6, window_bounds = array<i64: 1, 128>}, {transform_indices = @transform_7, window_bounds = array<i64: 8, 128>}]} {
    %c0 = arith.constant 0 : index
    %c0_0 = arith.constant 0 : index
    %c0_1 = arith.constant 0 : index
    %0 = vector.load %arg1[%c0, %c0_0, %c0_1] : memref<18x8x144xbf16, #tpu.memory_space<vmem>>, vector<1x8x144xbf16>
    %1 = vector.shape_cast %0 : vector<1x8x144xbf16> to vector<8x144xbf16>
    %c0_2 = arith.constant 0 : index
    %c0_3 = arith.constant 0 : index
    %2 = vector.load %arg2[%c0_2, %c0_3] : memref<144x256xbf16, #tpu.memory_space<vmem>>, vector<144x256xbf16>
    %cst = arith.constant dense<0.000000e+00> : vector<8x256xf32>
    %3 = tpu.matmul %1, %2, %cst {dimension_numbers = #tpu.dot_dimension_numbers<[1], [0], [0], [1], [0, 0, 1, 1], [], []>} : vector<8x144xbf16>, vector<144x256xbf16>, vector<8x256xf32> -> vector<8x256xf32>
    %c0_4 = arith.constant 0 : index
    %c0_5 = arith.constant 0 : index
    %4 = vector.load %arg3[%c0_4, %c0_5] : memref<1x256xf32, #tpu.memory_space<vmem>>, vector<1x256xf32>
    %5 = vector.broadcast %4 : vector<1x256xf32> to vector<8x256xf32>
    %6 = arith.addf %3, %5 : vector<8x256xf32>
    %cst_6 = arith.constant 0.000000e+00 : f32
    %7 = vector.broadcast %cst_6 : f32 to vector<8x256xf32>
    %8 = arith.maximumf %6, %7 : vector<8x256xf32>
    %c0_7 = arith.constant 0 : index
    %9 = memref.load %arg4[%c0_7] : memref<36xf32, #tpu.memory_space<smem>>
    %10 = vector.extract_strided_slice %8 {offsets = [0, 0], sizes = [8, 128], strides = [1, 1]} : vector<8x256xf32> to vector<8x128xf32>
    %11 = vector.broadcast %9 : f32 to vector<8x128xf32>
    %12 = arith.mulf %11, %10 : vector<8x128xf32>
    %c18 = arith.constant 18 : index
    %13 = memref.load %arg4[%c18] : memref<36xf32, #tpu.memory_space<smem>>
    %14 = vector.extract_strided_slice %8 {offsets = [0, 128], sizes = [8, 128], strides = [1, 1]} : vector<8x256xf32> to vector<8x128xf32>
    %15 = vector.broadcast %13 : f32 to vector<8x128xf32>
    %16 = arith.mulf %15, %14 : vector<8x128xf32>
    %17 = arith.addf %12, %16 : vector<8x128xf32>
    %c0_8 = arith.constant 0 : index
    %18 = memref.load %arg5[%c0_8] : memref<1xf32, #tpu.memory_space<smem>>
    %19 = vector.broadcast %18 : f32 to vector<8x128xf32>
    %20 = arith.addf %17, %19 : vector<8x128xf32>
    %c0_9 = arith.constant 0 : index
    %c0_10 = arith.constant 0 : index
    %21 = vector.load %arg9[%c0_9, %c0_10] : memref<8x128xf32, #tpu.memory_space<vmem>>, vector<8x128xf32>
    tpu.vector_store %arg9[%c0_9, %c0_10], %20 {strides = array<i32>} : memref<8x128xf32, #tpu.memory_space<vmem>>, vector<8x128xf32>,
    %c0_11 = arith.constant 0 : index
    %c0_12 = arith.constant 0 : index
    %22 = vector.load %arg9[%c0_11, %c0_12] : memref<8x128xf32, #tpu.memory_space<vmem>>, vector<8x128xf32>
    %c1 = arith.constant 1 : index
    %c0_13 = arith.constant 0 : index
    %c0_14 = arith.constant 0 : index
    %23 = vector.load %arg1[%c1, %c0_13, %c0_14] : memref<18x8x144xbf16, #tpu.memory_space<vmem>>, vector<1x8x144xbf16>
    %24 = vector.shape_cast %23 : vector<1x8x144xbf16> to vector<8x144xbf16>
    %c0_15 = arith.constant 0 : index
    %c0_16 = arith.constant 0 : index
    %25 = vector.load %arg2[%c0_15, %c0_16] : memref<144x256xbf16, #tpu.memory_space<vmem>>, vector<144x256xbf16>
    %cst_17 = arith.constant dense<0.000000e+00> : vector<8x256xf32>
    %26 = tpu.matmul %24, %25, %cst_17 {dimension_numbers = #tpu.dot_dimension_numbers<[1], [0], [0], [1], [0, 0, 1, 1], [], []>} : vector<8x144xbf16>, vector<144x256xbf16>, vector<8x256xf32> -> vector<8x256xf32>
    %c0_18 = arith.constant 0 : index
    %c0_19 = arith.constant 0 : index
    %27 = vector.load %arg3[%c0_18, %c0_19] : memref<1x256xf32, #tpu.memory_space<vmem>>, vector<1x256xf32>
    %28 = vector.broadcast %27 : vector<1x256xf32> to vector<8x256xf32>
    %29 = arith.addf %26, %28 : vector<8x256xf32>
    %cst_20 = arith.constant 0.000000e+00 : f32
    %30 = vector.broadcast %cst_20 : f32 to vector<8x256xf32>
    %31 = arith.maximumf %29, %30 : vector<8x256xf32>
    %c1_21 = arith.constant 1 : index
    %32 = memref.load %arg4[%c1_21] : memref<36xf32, #tpu.memory_space<smem>>
    %33 = vector.extract_strided_slice %31 {offsets = [0, 0], sizes = [8, 128], strides = [1, 1]} : vector<8x256xf32> to vector<8x128xf32>
    %34 = vector.broadcast %32 : f32 to vector<8x128xf32>
    %35 = arith.mulf %34, %33 : vector<8x128xf32>
    %c19 = arith.constant 19 : index
    %36 = memref.load %arg4[%c19] : memref<36xf32, #tpu.memory_space<smem>>
    %37 = vector.extract_strided_slice %31 {offsets = [0, 128], sizes = [8, 128], strides = [1, 1]} : vector<8x256xf32> to vector<8x128xf32>
    %38 = vector.broadcast %36 : f32 to vector<8x128xf32>
    %39 = arith.mulf %38, %37 : vector<8x128xf32>
    %40 = arith.addf %35, %39 : vector<8x128xf32>
    %41 = arith.addf %22, %40 : vector<8x128xf32>
    %c0_22 = arith.constant 0 : index
    %c0_23 = arith.constant 0 : index
    %42 = vector.load %arg9[%c0_22, %c0_23] : memref<8x128xf32, #tpu.memory_space<vmem>>, vector<8x128xf32>
    tpu.vector_store %arg9[%c0_22, %c0_23], %41 {strides = array<i32>} : memref<8x128xf32, #tpu.memory_space<vmem>>, vector<8x128xf32>,
    %c0_24 = arith.constant 0 : index
    %c0_25 = arith.constant 0 : index
    %43 = vector.load %arg9[%c0_24, %c0_25] : memref<8x128xf32, #tpu.memory_space<vmem>>, vector<8x128xf32>
    %c2 = arith.constant 2 : index
    %c0_26 = arith.constant 0 : index
    %c0_27 = arith.constant 0 : index
    %44 = vector.load %arg1[%c2, %c0_26, %c0_27] : memref<18x8x144xbf16, #tpu.memory_space<vmem>>, vector<1x8x144xbf16>
    %45 = vector.shape_cast %44 : vector<1x8x144xbf16> to vector<8x144xbf16>
    %c0_28 = arith.constant 0 : index
    %c0_29 = arith.constant 0 : index
    %46 = vector.load %arg2[%c0_28, %c0_29] : memref<144x256xbf16, #tpu.memory_space<vmem>>, vector<144x256xbf16>
    %cst_30 = arith.constant dense<0.000000e+00> : vector<8x256xf32>
    %47 = tpu.matmul %45, %46, %cst_30 {dimension_numbers = #tpu.dot_dimension_numbers<[1], [0], [0], [1], [0, 0, 1, 1], [], []>} : vector<8x144xbf16>, vector<144x256xbf16>, vector<8x256xf32> -> vector<8x256xf32>
    %c0_31 = arith.constant 0 : index
    %c0_32 = arith.constant 0 : index
    %48 = vector.load %arg3[%c0_31, %c0_32] : memref<1x256xf32, #tpu.memory_space<vmem>>, vector<1x256xf32>
    %49 = vector.broadcast %48 : vector<1x256xf32> to vector<8x256xf32>
    %50 = arith.addf %47, %49 : vector<8x256xf32>
    %cst_33 = arith.constant 0.000000e+00 : f32
    %51 = vector.broadcast %cst_33 : f32 to vector<8x256xf32>
    %52 = arith.maximumf %50, %51 : vector<8x256xf32>
    %c2_34 = arith.constant 2 : index
    %53 = memref.load %arg4[%c2_34] : memref<36xf32, #tpu.memory_space<smem>>
    %54 = vector.extract_strided_slice %52 {offsets = [0, 0], sizes = [8, 128], strides = [1, 1]} : vector<8x256xf32> to vector<8x128xf32>
    %55 = vector.broadcast %53 : f32 to vector<8x128xf32>
    %56 = arith.mulf %55, %54 : vector<8x128xf32>
    %c20 = arith.constant 20 : index
    %57 = memref.load %arg4[%c20] : memref<36xf32, #tpu.memory_space<smem>>
    %58 = vector.extract_strided_slice %52 {offsets = [0, 128], sizes = [8, 128], strides = [1, 1]} : vector<8x256xf32> to vector<8x128xf32>
    %59 = vector.broadcast %57 : f32 to vector<8x128xf32>
    %60 = arith.mulf %59, %58 : vector<8x128xf32>
    %61 = arith.addf %56, %60 : vector<8x128xf32>
    %62 = arith.addf %43, %61 : vector<8x128xf32>
    %c0_35 = arith.constant 0 : index
    %c0_36 = arith.constant 0 : index
    %63 = vector.load %arg9[%c0_35, %c0_36] : memref<8x128xf32, #tpu.memory_space<vmem>>, vector<8x128xf32>
    tpu.vector_store %arg9[%c0_35, %c0_36], %62 {strides = array<i32>} : memref<8x128xf32, #tpu.memory_space<vmem>>, vector<8x128xf32>,
    %c0_37 = arith.constant 0 : index
    %c0_38 = arith.constant 0 : index
    %64 = vector.load %arg9[%c0_37, %c0_38] : memref<8x128xf32, #tpu.memory_space<vmem>>, vector<8x128xf32>
    %c3 = arith.constant 3 : index
    %c0_39 = arith.constant 0 : index
    %c0_40 = arith.constant 0 : index
    %65 = vector.load %arg1[%c3, %c0_39, %c0_40] : memref<18x8x144xbf16, #tpu.memory_space<vmem>>, vector<1x8x144xbf16>
    %66 = vector.shape_cast %65 : vector<1x8x144xbf16> to vector<8x144xbf16>
    %c0_41 = arith.constant 0 : index
    %c0_42 = arith.constant 0 : index
    %67 = vector.load %arg2[%c0_41, %c0_42] : memref<144x256xbf16, #tpu.memory_space<vmem>>, vector<144x256xbf16>
    %cst_43 = arith.constant dense<0.000000e+00> : vector<8x256xf32>
    %68 = tpu.matmul %66, %67, %cst_43 {dimension_numbers = #tpu.dot_dimension_numbers<[1], [0], [0], [1], [0, 0, 1, 1], [], []>} : vector<8x144xbf16>, vector<144x256xbf16>, vector<8x256xf32> -> vector<8x256xf32>
    %c0_44 = arith.constant 0 : index
    %c0_45 = arith.constant 0 : index
    %69 = vector.load %arg3[%c0_44, %c0_45] : memref<1x256xf32, #tpu.memory_space<vmem>>, vector<1x256xf32>
    %70 = vector.broadcast %69 : vector<1x256xf32> to vector<8x256xf32>
    %71 = arith.addf %68, %70 : vector<8x256xf32>
    %cst_46 = arith.constant 0.000000e+00 : f32
    %72 = vector.broadcast %cst_46 : f32 to vector<8x256xf32>
    %73 = arith.maximumf %71, %72 : vector<8x256xf32>
    %c3_47 = arith.constant 3 : index
    %74 = memref.load %arg4[%c3_47] : memref<36xf32, #tpu.memory_space<smem>>
    %75 = vector.extract_strided_slice %73 {offsets = [0, 0], sizes = [8, 128], strides = [1, 1]} : vector<8x256xf32> to vector<8x128xf32>
    %76 = vector.broadcast %74 : f32 to vector<8x128xf32>
    %77 = arith.mulf %76, %75 : vector<8x128xf32>
    %c21 = arith.constant 21 : index
    %78 = memref.load %arg4[%c21] : memref<36xf32, #tpu.memory_space<smem>>
    %79 = vector.extract_strided_slice %73 {offsets = [0, 128], sizes = [8, 128], strides = [1, 1]} : vector<8x256xf32> to vector<8x128xf32>
    %80 = vector.broadcast %78 : f32 to vector<8x128xf32>
    %81 = arith.mulf %80, %79 : vector<8x128xf32>
    %82 = arith.addf %77, %81 : vector<8x128xf32>
    %83 = arith.addf %64, %82 : vector<8x128xf32>
    %c0_48 = arith.constant 0 : index
    %c0_49 = arith.constant 0 : index
    %84 = vector.load %arg9[%c0_48, %c0_49] : memref<8x128xf32, #tpu.memory_space<vmem>>, vector<8x128xf32>
    tpu.vector_store %arg9[%c0_48, %c0_49], %83 {strides = array<i32>} : memref<8x128xf32, #tpu.memory_space<vmem>>, vector<8x128xf32>,
    %c0_50 = arith.constant 0 : index
    %c0_51 = arith.constant 0 : index
    %85 = vector.load %arg9[%c0_50, %c0_51] : memref<8x128xf32, #tpu.memory_space<vmem>>, vector<8x128xf32>
    %c4 = arith.constant 4 : index
    %c0_52 = arith.constant 0 : index
    %c0_53 = arith.constant 0 : index
    %86 = vector.load %arg1[%c4, %c0_52, %c0_53] : memref<18x8x144xbf16, #tpu.memory_space<vmem>>, vector<1x8x144xbf16>
    %87 = vector.shape_cast %86 : vector<1x8x144xbf16> to vector<8x144xbf16>
    %c0_54 = arith.constant 0 : index
    %c0_55 = arith.constant 0 : index
    %88 = vector.load %arg2[%c0_54, %c0_55] : memref<144x256xbf16, #tpu.memory_space<vmem>>, vector<144x256xbf16>
    %cst_56 = arith.constant dense<0.000000e+00> : vector<8x256xf32>
    %89 = tpu.matmul %87, %88, %cst_56 {dimension_numbers = #tpu.dot_dimension_numbers<[1], [0], [0], [1], [0, 0, 1, 1], [], []>} : vector<8x144xbf16>, vector<144x256xbf16>, vector<8x256xf32> -> vector<8x256xf32>
    %c0_57 = arith.constant 0 : index
    %c0_58 = arith.constant 0 : index
    %90 = vector.load %arg3[%c0_57, %c0_58] : memref<1x256xf32, #tpu.memory_space<vmem>>, vector<1x256xf32>
    %91 = vector.broadcast %90 : vector<1x256xf32> to vector<8x256xf32>
    %92 = arith.addf %89, %91 : vector<8x256xf32>
    %cst_59 = arith.constant 0.000000e+00 : f32
    %93 = vector.broadcast %cst_59 : f32 to vector<8x256xf32>
    %94 = arith.maximumf %92, %93 : vector<8x256xf32>
    %c4_60 = arith.constant 4 : index
    %95 = memref.load %arg4[%c4_60] : memref<36xf32, #tpu.memory_space<smem>>
    %96 = vector.extract_strided_slice %94 {offsets = [0, 0], sizes = [8, 128], strides = [1, 1]} : vector<8x256xf32> to vector<8x128xf32>
    %97 = vector.broadcast %95 : f32 to vector<8x128xf32>
    %98 = arith.mulf %97, %96 : vector<8x128xf32>
    %c22 = arith.constant 22 : index
    %99 = memref.load %arg4[%c22] : memref<36xf32, #tpu.memory_space<smem>>
    %100 = vector.extract_strided_slice %94 {offsets = [0, 128], sizes = [8, 128], strides = [1, 1]} : vector<8x256xf32> to vector<8x128xf32>
    %101 = vector.broadcast %99 : f32 to vector<8x128xf32>
    %102 = arith.mulf %101, %100 : vector<8x128xf32>
    %103 = arith.addf %98, %102 : vector<8x128xf32>
    %104 = arith.addf %85, %103 : vector<8x128xf32>
    %c0_61 = arith.constant 0 : index
    %c0_62 = arith.constant 0 : index
    %105 = vector.load %arg9[%c0_61, %c0_62] : memref<8x128xf32, #tpu.memory_space<vmem>>, vector<8x128xf32>
    tpu.vector_store %arg9[%c0_61, %c0_62], %104 {strides = array<i32>} : memref<8x128xf32, #tpu.memory_space<vmem>>, vector<8x128xf32>,
    %c0_63 = arith.constant 0 : index
    %c0_64 = arith.constant 0 : index
    %106 = vector.load %arg9[%c0_63, %c0_64] : memref<8x128xf32, #tpu.memory_space<vmem>>, vector<8x128xf32>
    %c5 = arith.constant 5 : index
    %c0_65 = arith.constant 0 : index
    %c0_66 = arith.constant 0 : index
    %107 = vector.load %arg1[%c5, %c0_65, %c0_66] : memref<18x8x144xbf16, #tpu.memory_space<vmem>>, vector<1x8x144xbf16>
    %108 = vector.shape_cast %107 : vector<1x8x144xbf16> to vector<8x144xbf16>
    %c0_67 = arith.constant 0 : index
    %c0_68 = arith.constant 0 : index
    %109 = vector.load %arg2[%c0_67, %c0_68] : memref<144x256xbf16, #tpu.memory_space<vmem>>, vector<144x256xbf16>
    %cst_69 = arith.constant dense<0.000000e+00> : vector<8x256xf32>
    %110 = tpu.matmul %108, %109, %cst_69 {dimension_numbers = #tpu.dot_dimension_numbers<[1], [0], [0], [1], [0, 0, 1, 1], [], []>} : vector<8x144xbf16>, vector<144x256xbf16>, vector<8x256xf32> -> vector<8x256xf32>
    %c0_70 = arith.constant 0 : index
    %c0_71 = arith.constant 0 : index
    %111 = vector.load %arg3[%c0_70, %c0_71] : memref<1x256xf32, #tpu.memory_space<vmem>>, vector<1x256xf32>
    %112 = vector.broadcast %111 : vector<1x256xf32> to vector<8x256xf32>
    %113 = arith.addf %110, %112 : vector<8x256xf32>
    %cst_72 = arith.constant 0.000000e+00 : f32
    %114 = vector.broadcast %cst_72 : f32 to vector<8x256xf32>
    %115 = arith.maximumf %113, %114 : vector<8x256xf32>
    %c5_73 = arith.constant 5 : index
    %116 = memref.load %arg4[%c5_73] : memref<36xf32, #tpu.memory_space<smem>>
    %117 = vector.extract_strided_slice %115 {offsets = [0, 0], sizes = [8, 128], strides = [1, 1]} : vector<8x256xf32> to vector<8x128xf32>
    %118 = vector.broadcast %116 : f32 to vector<8x128xf32>
    %119 = arith.mulf %118, %117 : vector<8x128xf32>
    %c23 = arith.constant 23 : index
    %120 = memref.load %arg4[%c23] : memref<36xf32, #tpu.memory_space<smem>>
    %121 = vector.extract_strided_slice %115 {offsets = [0, 128], sizes = [8, 128], strides = [1, 1]} : vector<8x256xf32> to vector<8x128xf32>
    %122 = vector.broadcast %120 : f32 to vector<8x128xf32>
    %123 = arith.mulf %122, %121 : vector<8x128xf32>
    %124 = arith.addf %119, %123 : vector<8x128xf32>
    %125 = arith.addf %106, %124 : vector<8x128xf32>
    %c0_74 = arith.constant 0 : index
    %c0_75 = arith.constant 0 : index
    %126 = vector.load %arg9[%c0_74, %c0_75] : memref<8x128xf32, #tpu.memory_space<vmem>>, vector<8x128xf32>
    tpu.vector_store %arg9[%c0_74, %c0_75], %125 {strides = array<i32>} : memref<8x128xf32, #tpu.memory_space<vmem>>, vector<8x128xf32>,
    %c0_76 = arith.constant 0 : index
    %c0_77 = arith.constant 0 : index
    %127 = vector.load %arg9[%c0_76, %c0_77] : memref<8x128xf32, #tpu.memory_space<vmem>>, vector<8x128xf32>
    %c6 = arith.constant 6 : index
    %c0_78 = arith.constant 0 : index
    %c0_79 = arith.constant 0 : index
    %128 = vector.load %arg1[%c6, %c0_78, %c0_79] : memref<18x8x144xbf16, #tpu.memory_space<vmem>>, vector<1x8x144xbf16>
    %129 = vector.shape_cast %128 : vector<1x8x144xbf16> to vector<8x144xbf16>
    %c0_80 = arith.constant 0 : index
    %c0_81 = arith.constant 0 : index
    %130 = vector.load %arg2[%c0_80, %c0_81] : memref<144x256xbf16, #tpu.memory_space<vmem>>, vector<144x256xbf16>
    %cst_82 = arith.constant dense<0.000000e+00> : vector<8x256xf32>
    %131 = tpu.matmul %129, %130, %cst_82 {dimension_numbers = #tpu.dot_dimension_numbers<[1], [0], [0], [1], [0, 0, 1, 1], [], []>} : vector<8x144xbf16>, vector<144x256xbf16>, vector<8x256xf32> -> vector<8x256xf32>
    %c0_83 = arith.constant 0 : index
    %c0_84 = arith.constant 0 : index
    %132 = vector.load %arg3[%c0_83, %c0_84] : memref<1x256xf32, #tpu.memory_space<vmem>>, vector<1x256xf32>
    %133 = vector.broadcast %132 : vector<1x256xf32> to vector<8x256xf32>
    %134 = arith.addf %131, %133 : vector<8x256xf32>
    %cst_85 = arith.constant 0.000000e+00 : f32
    %135 = vector.broadcast %cst_85 : f32 to vector<8x256xf32>
    %136 = arith.maximumf %134, %135 : vector<8x256xf32>
    %c6_86 = arith.constant 6 : index
    %137 = memref.load %arg4[%c6_86] : memref<36xf32, #tpu.memory_space<smem>>
    %138 = vector.extract_strided_slice %136 {offsets = [0, 0], sizes = [8, 128], strides = [1, 1]} : vector<8x256xf32> to vector<8x128xf32>
    %139 = vector.broadcast %137 : f32 to vector<8x128xf32>
    %140 = arith.mulf %139, %138 : vector<8x128xf32>
    %c24 = arith.constant 24 : index
    %141 = memref.load %arg4[%c24] : memref<36xf32, #tpu.memory_space<smem>>
    %142 = vector.extract_strided_slice %136 {offsets = [0, 128], sizes = [8, 128], strides = [1, 1]} : vector<8x256xf32> to vector<8x128xf32>
    %143 = vector.broadcast %141 : f32 to vector<8x128xf32>
    %144 = arith.mulf %143, %142 : vector<8x128xf32>
    %145 = arith.addf %140, %144 : vector<8x128xf32>
    %146 = arith.addf %127, %145 : vector<8x128xf32>
    %c0_87 = arith.constant 0 : index
    %c0_88 = arith.constant 0 : index
    %147 = vector.load %arg9[%c0_87, %c0_88] : memref<8x128xf32, #tpu.memory_space<vmem>>, vector<8x128xf32>
    tpu.vector_store %arg9[%c0_87, %c0_88], %146 {strides = array<i32>} : memref<8x128xf32, #tpu.memory_space<vmem>>, vector<8x128xf32>,
    %c0_89 = arith.constant 0 : index
    %c0_90 = arith.constant 0 : index
    %148 = vector.load %arg9[%c0_89, %c0_90] : memref<8x128xf32, #tpu.memory_space<vmem>>, vector<8x128xf32>
    %c7 = arith.constant 7 : index
    %c0_91 = arith.constant 0 : index
    %c0_92 = arith.constant 0 : index
    %149 = vector.load %arg1[%c7, %c0_91, %c0_92] : memref<18x8x144xbf16, #tpu.memory_space<vmem>>, vector<1x8x144xbf16>
    %150 = vector.shape_cast %149 : vector<1x8x144xbf16> to vector<8x144xbf16>
    %c0_93 = arith.constant 0 : index
    %c0_94 = arith.constant 0 : index
    %151 = vector.load %arg2[%c0_93, %c0_94] : memref<144x256xbf16, #tpu.memory_space<vmem>>, vector<144x256xbf16>
    %cst_95 = arith.constant dense<0.000000e+00> : vector<8x256xf32>
    %152 = tpu.matmul %150, %151, %cst_95 {dimension_numbers = #tpu.dot_dimension_numbers<[1], [0], [0], [1], [0, 0, 1, 1], [], []>} : vector<8x144xbf16>, vector<144x256xbf16>, vector<8x256xf32> -> vector<8x256xf32>
    %c0_96 = arith.constant 0 : index
    %c0_97 = arith.constant 0 : index
    %153 = vector.load %arg3[%c0_96, %c0_97] : memref<1x256xf32, #tpu.memory_space<vmem>>, vector<1x256xf32>
    %154 = vector.broadcast %153 : vector<1x256xf32> to vector<8x256xf32>
    %155 = arith.addf %152, %154 : vector<8x256xf32>
    %cst_98 = arith.constant 0.000000e+00 : f32
    %156 = vector.broadcast %cst_98 : f32 to vector<8x256xf32>
    %157 = arith.maximumf %155, %156 : vector<8x256xf32>
    %c7_99 = arith.constant 7 : index
    %158 = memref.load %arg4[%c7_99] : memref<36xf32, #tpu.memory_space<smem>>
    %159 = vector.extract_strided_slice %157 {offsets = [0, 0], sizes = [8, 128], strides = [1, 1]} : vector<8x256xf32> to vector<8x128xf32>
    %160 = vector.broadcast %158 : f32 to vector<8x128xf32>
    %161 = arith.mulf %160, %159 : vector<8x128xf32>
    %c25 = arith.constant 25 : index
    %162 = memref.load %arg4[%c25] : memref<36xf32, #tpu.memory_space<smem>>
    %163 = vector.extract_strided_slice %157 {offsets = [0, 128], sizes = [8, 128], strides = [1, 1]} : vector<8x256xf32> to vector<8x128xf32>
    %164 = vector.broadcast %162 : f32 to vector<8x128xf32>
    %165 = arith.mulf %164, %163 : vector<8x128xf32>
    %166 = arith.addf %161, %165 : vector<8x128xf32>
    %167 = arith.addf %148, %166 : vector<8x128xf32>
    %c0_100 = arith.constant 0 : index
    %c0_101 = arith.constant 0 : index
    %168 = vector.load %arg9[%c0_100, %c0_101] : memref<8x128xf32, #tpu.memory_space<vmem>>, vector<8x128xf32>
    tpu.vector_store %arg9[%c0_100, %c0_101], %167 {strides = array<i32>} : memref<8x128xf32, #tpu.memory_space<vmem>>, vector<8x128xf32>,
    %c0_102 = arith.constant 0 : index
    %c0_103 = arith.constant 0 : index
    %169 = vector.load %arg9[%c0_102, %c0_103] : memref<8x128xf32, #tpu.memory_space<vmem>>, vector<8x128xf32>
    %c8 = arith.constant 8 : index
    %c0_104 = arith.constant 0 : index
    %c0_105 = arith.constant 0 : index
    %170 = vector.load %arg1[%c8, %c0_104, %c0_105] : memref<18x8x144xbf16, #tpu.memory_space<vmem>>, vector<1x8x144xbf16>
    %171 = vector.shape_cast %170 : vector<1x8x144xbf16> to vector<8x144xbf16>
    %c0_106 = arith.constant 0 : index
    %c0_107 = arith.constant 0 : index
    %172 = vector.load %arg2[%c0_106, %c0_107] : memref<144x256xbf16, #tpu.memory_space<vmem>>, vector<144x256xbf16>
    %cst_108 = arith.constant dense<0.000000e+00> : vector<8x256xf32>
    %173 = tpu.matmul %171, %172, %cst_108 {dimension_numbers = #tpu.dot_dimension_numbers<[1], [0], [0], [1], [0, 0, 1, 1], [], []>} : vector<8x144xbf16>, vector<144x256xbf16>, vector<8x256xf32> -> vector<8x256xf32>
    %c0_109 = arith.constant 0 : index
    %c0_110 = arith.constant 0 : index
    %174 = vector.load %arg3[%c0_109, %c0_110] : memref<1x256xf32, #tpu.memory_space<vmem>>, vector<1x256xf32>
    %175 = vector.broadcast %174 : vector<1x256xf32> to vector<8x256xf32>
    %176 = arith.addf %173, %175 : vector<8x256xf32>
    %cst_111 = arith.constant 0.000000e+00 : f32
    %177 = vector.broadcast %cst_111 : f32 to vector<8x256xf32>
    %178 = arith.maximumf %176, %177 : vector<8x256xf32>
    %c8_112 = arith.constant 8 : index
    %179 = memref.load %arg4[%c8_112] : memref<36xf32, #tpu.memory_space<smem>>
    %180 = vector.extract_strided_slice %178 {offsets = [0, 0], sizes = [8, 128], strides = [1, 1]} : vector<8x256xf32> to vector<8x128xf32>
    %181 = vector.broadcast %179 : f32 to vector<8x128xf32>
    %182 = arith.mulf %181, %180 : vector<8x128xf32>
    %c26 = arith.constant 26 : index
    %183 = memref.load %arg4[%c26] : memref<36xf32, #tpu.memory_space<smem>>
    %184 = vector.extract_strided_slice %178 {offsets = [0, 128], sizes = [8, 128], strides = [1, 1]} : vector<8x256xf32> to vector<8x128xf32>
    %185 = vector.broadcast %183 : f32 to vector<8x128xf32>
    %186 = arith.mulf %185, %184 : vector<8x128xf32>
    %187 = arith.addf %182, %186 : vector<8x128xf32>
    %188 = arith.addf %169, %187 : vector<8x128xf32>
    %c0_113 = arith.constant 0 : index
    %c0_114 = arith.constant 0 : index
    %189 = vector.load %arg9[%c0_113, %c0_114] : memref<8x128xf32, #tpu.memory_space<vmem>>, vector<8x128xf32>
    tpu.vector_store %arg9[%c0_113, %c0_114], %188 {strides = array<i32>} : memref<8x128xf32, #tpu.memory_space<vmem>>, vector<8x128xf32>,
    %c0_115 = arith.constant 0 : index
    %c0_116 = arith.constant 0 : index
    %190 = vector.load %arg9[%c0_115, %c0_116] : memref<8x128xf32, #tpu.memory_space<vmem>>, vector<8x128xf32>
    %c9 = arith.constant 9 : index
    %c0_117 = arith.constant 0 : index
    %c0_118 = arith.constant 0 : index
    %191 = vector.load %arg1[%c9, %c0_117, %c0_118] : memref<18x8x144xbf16, #tpu.memory_space<vmem>>, vector<1x8x144xbf16>
    %192 = vector.shape_cast %191 : vector<1x8x144xbf16> to vector<8x144xbf16>
    %c0_119 = arith.constant 0 : index
    %c0_120 = arith.constant 0 : index
    %193 = vector.load %arg2[%c0_119, %c0_120] : memref<144x256xbf16, #tpu.memory_space<vmem>>, vector<144x256xbf16>
    %cst_121 = arith.constant dense<0.000000e+00> : vector<8x256xf32>
    %194 = tpu.matmul %192, %193, %cst_121 {dimension_numbers = #tpu.dot_dimension_numbers<[1], [0], [0], [1], [0, 0, 1, 1], [], []>} : vector<8x144xbf16>, vector<144x256xbf16>, vector<8x256xf32> -> vector<8x256xf32>
    %c0_122 = arith.constant 0 : index
    %c0_123 = arith.constant 0 : index
    %195 = vector.load %arg3[%c0_122, %c0_123] : memref<1x256xf32, #tpu.memory_space<vmem>>, vector<1x256xf32>
    %196 = vector.broadcast %195 : vector<1x256xf32> to vector<8x256xf32>
    %197 = arith.addf %194, %196 : vector<8x256xf32>
    %cst_124 = arith.constant 0.000000e+00 : f32
    %198 = vector.broadcast %cst_124 : f32 to vector<8x256xf32>
    %199 = arith.maximumf %197, %198 : vector<8x256xf32>
    %c9_125 = arith.constant 9 : index
    %200 = memref.load %arg4[%c9_125] : memref<36xf32, #tpu.memory_space<smem>>
    %201 = vector.extract_strided_slice %199 {offsets = [0, 0], sizes = [8, 128], strides = [1, 1]} : vector<8x256xf32> to vector<8x128xf32>
    %202 = vector.broadcast %200 : f32 to vector<8x128xf32>
    %203 = arith.mulf %202, %201 : vector<8x128xf32>
    %c27 = arith.constant 27 : index
    %204 = memref.load %arg4[%c27] : memref<36xf32, #tpu.memory_space<smem>>
    %205 = vector.extract_strided_slice %199 {offsets = [0, 128], sizes = [8, 128], strides = [1, 1]} : vector<8x256xf32> to vector<8x128xf32>
    %206 = vector.broadcast %204 : f32 to vector<8x128xf32>
    %207 = arith.mulf %206, %205 : vector<8x128xf32>
    %208 = arith.addf %203, %207 : vector<8x128xf32>
    %209 = arith.addf %190, %208 : vector<8x128xf32>
    %c0_126 = arith.constant 0 : index
    %c0_127 = arith.constant 0 : index
    %210 = vector.load %arg9[%c0_126, %c0_127] : memref<8x128xf32, #tpu.memory_space<vmem>>, vector<8x128xf32>
    tpu.vector_store %arg9[%c0_126, %c0_127], %209 {strides = array<i32>} : memref<8x128xf32, #tpu.memory_space<vmem>>, vector<8x128xf32>,
    %c0_128 = arith.constant 0 : index
    %c0_129 = arith.constant 0 : index
    %211 = vector.load %arg9[%c0_128, %c0_129] : memref<8x128xf32, #tpu.memory_space<vmem>>, vector<8x128xf32>
    %c10 = arith.constant 10 : index
    %c0_130 = arith.constant 0 : index
    %c0_131 = arith.constant 0 : index
    %212 = vector.load %arg1[%c10, %c0_130, %c0_131] : memref<18x8x144xbf16, #tpu.memory_space<vmem>>, vector<1x8x144xbf16>
    %213 = vector.shape_cast %212 : vector<1x8x144xbf16> to vector<8x144xbf16>
    %c0_132 = arith.constant 0 : index
    %c0_133 = arith.constant 0 : index
    %214 = vector.load %arg2[%c0_132, %c0_133] : memref<144x256xbf16, #tpu.memory_space<vmem>>, vector<144x256xbf16>
    %cst_134 = arith.constant dense<0.000000e+00> : vector<8x256xf32>
    %215 = tpu.matmul %213, %214, %cst_134 {dimension_numbers = #tpu.dot_dimension_numbers<[1], [0], [0], [1], [0, 0, 1, 1], [], []>} : vector<8x144xbf16>, vector<144x256xbf16>, vector<8x256xf32> -> vector<8x256xf32>
    %c0_135 = arith.constant 0 : index
    %c0_136 = arith.constant 0 : index
    %216 = vector.load %arg3[%c0_135, %c0_136] : memref<1x256xf32, #tpu.memory_space<vmem>>, vector<1x256xf32>
    %217 = vector.broadcast %216 : vector<1x256xf32> to vector<8x256xf32>
    %218 = arith.addf %215, %217 : vector<8x256xf32>
    %cst_137 = arith.constant 0.000000e+00 : f32
    %219 = vector.broadcast %cst_137 : f32 to vector<8x256xf32>
    %220 = arith.maximumf %218, %219 : vector<8x256xf32>
    %c10_138 = arith.constant 10 : index
    %221 = memref.load %arg4[%c10_138] : memref<36xf32, #tpu.memory_space<smem>>
    %222 = vector.extract_strided_slice %220 {offsets = [0, 0], sizes = [8, 128], strides = [1, 1]} : vector<8x256xf32> to vector<8x128xf32>
    %223 = vector.broadcast %221 : f32 to vector<8x128xf32>
    %224 = arith.mulf %223, %222 : vector<8x128xf32>
    %c28 = arith.constant 28 : index
    %225 = memref.load %arg4[%c28] : memref<36xf32, #tpu.memory_space<smem>>
    %226 = vector.extract_strided_slice %220 {offsets = [0, 128], sizes = [8, 128], strides = [1, 1]} : vector<8x256xf32> to vector<8x128xf32>
    %227 = vector.broadcast %225 : f32 to vector<8x128xf32>
    %228 = arith.mulf %227, %226 : vector<8x128xf32>
    %229 = arith.addf %224, %228 : vector<8x128xf32>
    %230 = arith.addf %211, %229 : vector<8x128xf32>
    %c0_139 = arith.constant 0 : index
    %c0_140 = arith.constant 0 : index
    %231 = vector.load %arg9[%c0_139, %c0_140] : memref<8x128xf32, #tpu.memory_space<vmem>>, vector<8x128xf32>
    tpu.vector_store %arg9[%c0_139, %c0_140], %230 {strides = array<i32>} : memref<8x128xf32, #tpu.memory_space<vmem>>, vector<8x128xf32>,
    %c0_141 = arith.constant 0 : index
    %c0_142 = arith.constant 0 : index
    %232 = vector.load %arg9[%c0_141, %c0_142] : memref<8x128xf32, #tpu.memory_space<vmem>>, vector<8x128xf32>
    %c11 = arith.constant 11 : index
    %c0_143 = arith.constant 0 : index
    %c0_144 = arith.constant 0 : index
    %233 = vector.load %arg1[%c11, %c0_143, %c0_144] : memref<18x8x144xbf16, #tpu.memory_space<vmem>>, vector<1x8x144xbf16>
    %234 = vector.shape_cast %233 : vector<1x8x144xbf16> to vector<8x144xbf16>
    %c0_145 = arith.constant 0 : index
    %c0_146 = arith.constant 0 : index
    %235 = vector.load %arg2[%c0_145, %c0_146] : memref<144x256xbf16, #tpu.memory_space<vmem>>, vector<144x256xbf16>
    %cst_147 = arith.constant dense<0.000000e+00> : vector<8x256xf32>
    %236 = tpu.matmul %234, %235, %cst_147 {dimension_numbers = #tpu.dot_dimension_numbers<[1], [0], [0], [1], [0, 0, 1, 1], [], []>} : vector<8x144xbf16>, vector<144x256xbf16>, vector<8x256xf32> -> vector<8x256xf32>
    %c0_148 = arith.constant 0 : index
    %c0_149 = arith.constant 0 : index
    %237 = vector.load %arg3[%c0_148, %c0_149] : memref<1x256xf32, #tpu.memory_space<vmem>>, vector<1x256xf32>
    %238 = vector.broadcast %237 : vector<1x256xf32> to vector<8x256xf32>
    %239 = arith.addf %236, %238 : vector<8x256xf32>
    %cst_150 = arith.constant 0.000000e+00 : f32
    %240 = vector.broadcast %cst_150 : f32 to vector<8x256xf32>
    %241 = arith.maximumf %239, %240 : vector<8x256xf32>
    %c11_151 = arith.constant 11 : index
    %242 = memref.load %arg4[%c11_151] : memref<36xf32, #tpu.memory_space<smem>>
    %243 = vector.extract_strided_slice %241 {offsets = [0, 0], sizes = [8, 128], strides = [1, 1]} : vector<8x256xf32> to vector<8x128xf32>
    %244 = vector.broadcast %242 : f32 to vector<8x128xf32>
    %245 = arith.mulf %244, %243 : vector<8x128xf32>
    %c29 = arith.constant 29 : index
    %246 = memref.load %arg4[%c29] : memref<36xf32, #tpu.memory_space<smem>>
    %247 = vector.extract_strided_slice %241 {offsets = [0, 128], sizes = [8, 128], strides = [1, 1]} : vector<8x256xf32> to vector<8x128xf32>
    %248 = vector.broadcast %246 : f32 to vector<8x128xf32>
    %249 = arith.mulf %248, %247 : vector<8x128xf32>
    %250 = arith.addf %245, %249 : vector<8x128xf32>
    %251 = arith.addf %232, %250 : vector<8x128xf32>
    %c0_152 = arith.constant 0 : index
    %c0_153 = arith.constant 0 : index
    %252 = vector.load %arg9[%c0_152, %c0_153] : memref<8x128xf32, #tpu.memory_space<vmem>>, vector<8x128xf32>
    tpu.vector_store %arg9[%c0_152, %c0_153], %251 {strides = array<i32>} : memref<8x128xf32, #tpu.memory_space<vmem>>, vector<8x128xf32>,
    %c0_154 = arith.constant 0 : index
    %c0_155 = arith.constant 0 : index
    %253 = vector.load %arg9[%c0_154, %c0_155] : memref<8x128xf32, #tpu.memory_space<vmem>>, vector<8x128xf32>
    %c12 = arith.constant 12 : index
    %c0_156 = arith.constant 0 : index
    %c0_157 = arith.constant 0 : index
    %254 = vector.load %arg1[%c12, %c0_156, %c0_157] : memref<18x8x144xbf16, #tpu.memory_space<vmem>>, vector<1x8x144xbf16>
    %255 = vector.shape_cast %254 : vector<1x8x144xbf16> to vector<8x144xbf16>
    %c0_158 = arith.constant 0 : index
    %c0_159 = arith.constant 0 : index
    %256 = vector.load %arg2[%c0_158, %c0_159] : memref<144x256xbf16, #tpu.memory_space<vmem>>, vector<144x256xbf16>
    %cst_160 = arith.constant dense<0.000000e+00> : vector<8x256xf32>
    %257 = tpu.matmul %255, %256, %cst_160 {dimension_numbers = #tpu.dot_dimension_numbers<[1], [0], [0], [1], [0, 0, 1, 1], [], []>} : vector<8x144xbf16>, vector<144x256xbf16>, vector<8x256xf32> -> vector<8x256xf32>
    %c0_161 = arith.constant 0 : index
    %c0_162 = arith.constant 0 : index
    %258 = vector.load %arg3[%c0_161, %c0_162] : memref<1x256xf32, #tpu.memory_space<vmem>>, vector<1x256xf32>
    %259 = vector.broadcast %258 : vector<1x256xf32> to vector<8x256xf32>
    %260 = arith.addf %257, %259 : vector<8x256xf32>
    %cst_163 = arith.constant 0.000000e+00 : f32
    %261 = vector.broadcast %cst_163 : f32 to vector<8x256xf32>
    %262 = arith.maximumf %260, %261 : vector<8x256xf32>
    %c12_164 = arith.constant 12 : index
    %263 = memref.load %arg4[%c12_164] : memref<36xf32, #tpu.memory_space<smem>>
    %264 = vector.extract_strided_slice %262 {offsets = [0, 0], sizes = [8, 128], strides = [1, 1]} : vector<8x256xf32> to vector<8x128xf32>
    %265 = vector.broadcast %263 : f32 to vector<8x128xf32>
    %266 = arith.mulf %265, %264 : vector<8x128xf32>
    %c30 = arith.constant 30 : index
    %267 = memref.load %arg4[%c30] : memref<36xf32, #tpu.memory_space<smem>>
    %268 = vector.extract_strided_slice %262 {offsets = [0, 128], sizes = [8, 128], strides = [1, 1]} : vector<8x256xf32> to vector<8x128xf32>
    %269 = vector.broadcast %267 : f32 to vector<8x128xf32>
    %270 = arith.mulf %269, %268 : vector<8x128xf32>
    %271 = arith.addf %266, %270 : vector<8x128xf32>
    %272 = arith.addf %253, %271 : vector<8x128xf32>
    %c0_165 = arith.constant 0 : index
    %c0_166 = arith.constant 0 : index
    %273 = vector.load %arg9[%c0_165, %c0_166] : memref<8x128xf32, #tpu.memory_space<vmem>>, vector<8x128xf32>
    tpu.vector_store %arg9[%c0_165, %c0_166], %272 {strides = array<i32>} : memref<8x128xf32, #tpu.memory_space<vmem>>, vector<8x128xf32>,
    %c0_167 = arith.constant 0 : index
    %c0_168 = arith.constant 0 : index
    %274 = vector.load %arg9[%c0_167, %c0_168] : memref<8x128xf32, #tpu.memory_space<vmem>>, vector<8x128xf32>
    %c13 = arith.constant 13 : index
    %c0_169 = arith.constant 0 : index
    %c0_170 = arith.constant 0 : index
    %275 = vector.load %arg1[%c13, %c0_169, %c0_170] : memref<18x8x144xbf16, #tpu.memory_space<vmem>>, vector<1x8x144xbf16>
    %276 = vector.shape_cast %275 : vector<1x8x144xbf16> to vector<8x144xbf16>
    %c0_171 = arith.constant 0 : index
    %c0_172 = arith.constant 0 : index
    %277 = vector.load %arg2[%c0_171, %c0_172] : memref<144x256xbf16, #tpu.memory_space<vmem>>, vector<144x256xbf16>
    %cst_173 = arith.constant dense<0.000000e+00> : vector<8x256xf32>
    %278 = tpu.matmul %276, %277, %cst_173 {dimension_numbers = #tpu.dot_dimension_numbers<[1], [0], [0], [1], [0, 0, 1, 1], [], []>} : vector<8x144xbf16>, vector<144x256xbf16>, vector<8x256xf32> -> vector<8x256xf32>
    %c0_174 = arith.constant 0 : index
    %c0_175 = arith.constant 0 : index
    %279 = vector.load %arg3[%c0_174, %c0_175] : memref<1x256xf32, #tpu.memory_space<vmem>>, vector<1x256xf32>
    %280 = vector.broadcast %279 : vector<1x256xf32> to vector<8x256xf32>
    %281 = arith.addf %278, %280 : vector<8x256xf32>
    %cst_176 = arith.constant 0.000000e+00 : f32
    %282 = vector.broadcast %cst_176 : f32 to vector<8x256xf32>
    %283 = arith.maximumf %281, %282 : vector<8x256xf32>
    %c13_177 = arith.constant 13 : index
    %284 = memref.load %arg4[%c13_177] : memref<36xf32, #tpu.memory_space<smem>>
    %285 = vector.extract_strided_slice %283 {offsets = [0, 0], sizes = [8, 128], strides = [1, 1]} : vector<8x256xf32> to vector<8x128xf32>
    %286 = vector.broadcast %284 : f32 to vector<8x128xf32>
    %287 = arith.mulf %286, %285 : vector<8x128xf32>
    %c31 = arith.constant 31 : index
    %288 = memref.load %arg4[%c31] : memref<36xf32, #tpu.memory_space<smem>>
    %289 = vector.extract_strided_slice %283 {offsets = [0, 128], sizes = [8, 128], strides = [1, 1]} : vector<8x256xf32> to vector<8x128xf32>
    %290 = vector.broadcast %288 : f32 to vector<8x128xf32>
    %291 = arith.mulf %290, %289 : vector<8x128xf32>
    %292 = arith.addf %287, %291 : vector<8x128xf32>
    %293 = arith.addf %274, %292 : vector<8x128xf32>
    %c0_178 = arith.constant 0 : index
    %c0_179 = arith.constant 0 : index
    %294 = vector.load %arg9[%c0_178, %c0_179] : memref<8x128xf32, #tpu.memory_space<vmem>>, vector<8x128xf32>
    tpu.vector_store %arg9[%c0_178, %c0_179], %293 {strides = array<i32>} : memref<8x128xf32, #tpu.memory_space<vmem>>, vector<8x128xf32>,
    %c0_180 = arith.constant 0 : index
    %c0_181 = arith.constant 0 : index
    %295 = vector.load %arg9[%c0_180, %c0_181] : memref<8x128xf32, #tpu.memory_space<vmem>>, vector<8x128xf32>
    %c14 = arith.constant 14 : index
    %c0_182 = arith.constant 0 : index
    %c0_183 = arith.constant 0 : index
    %296 = vector.load %arg1[%c14, %c0_182, %c0_183] : memref<18x8x144xbf16, #tpu.memory_space<vmem>>, vector<1x8x144xbf16>
    %297 = vector.shape_cast %296 : vector<1x8x144xbf16> to vector<8x144xbf16>
    %c0_184 = arith.constant 0 : index
    %c0_185 = arith.constant 0 : index
    %298 = vector.load %arg2[%c0_184, %c0_185] : memref<144x256xbf16, #tpu.memory_space<vmem>>, vector<144x256xbf16>
    %cst_186 = arith.constant dense<0.000000e+00> : vector<8x256xf32>
    %299 = tpu.matmul %297, %298, %cst_186 {dimension_numbers = #tpu.dot_dimension_numbers<[1], [0], [0], [1], [0, 0, 1, 1], [], []>} : vector<8x144xbf16>, vector<144x256xbf16>, vector<8x256xf32> -> vector<8x256xf32>
    %c0_187 = arith.constant 0 : index
    %c0_188 = arith.constant 0 : index
    %300 = vector.load %arg3[%c0_187, %c0_188] : memref<1x256xf32, #tpu.memory_space<vmem>>, vector<1x256xf32>
    %301 = vector.broadcast %300 : vector<1x256xf32> to vector<8x256xf32>
    %302 = arith.addf %299, %301 : vector<8x256xf32>
    %cst_189 = arith.constant 0.000000e+00 : f32
    %303 = vector.broadcast %cst_189 : f32 to vector<8x256xf32>
    %304 = arith.maximumf %302, %303 : vector<8x256xf32>
    %c14_190 = arith.constant 14 : index
    %305 = memref.load %arg4[%c14_190] : memref<36xf32, #tpu.memory_space<smem>>
    %306 = vector.extract_strided_slice %304 {offsets = [0, 0], sizes = [8, 128], strides = [1, 1]} : vector<8x256xf32> to vector<8x128xf32>
    %307 = vector.broadcast %305 : f32 to vector<8x128xf32>
    %308 = arith.mulf %307, %306 : vector<8x128xf32>
    %c32 = arith.constant 32 : index
    %309 = memref.load %arg4[%c32] : memref<36xf32, #tpu.memory_space<smem>>
    %310 = vector.extract_strided_slice %304 {offsets = [0, 128], sizes = [8, 128], strides = [1, 1]} : vector<8x256xf32> to vector<8x128xf32>
    %311 = vector.broadcast %309 : f32 to vector<8x128xf32>
    %312 = arith.mulf %311, %310 : vector<8x128xf32>
    %313 = arith.addf %308, %312 : vector<8x128xf32>
    %314 = arith.addf %295, %313 : vector<8x128xf32>
    %c0_191 = arith.constant 0 : index
    %c0_192 = arith.constant 0 : index
    %315 = vector.load %arg9[%c0_191, %c0_192] : memref<8x128xf32, #tpu.memory_space<vmem>>, vector<8x128xf32>
    tpu.vector_store %arg9[%c0_191, %c0_192], %314 {strides = array<i32>} : memref<8x128xf32, #tpu.memory_space<vmem>>, vector<8x128xf32>,
    %c0_193 = arith.constant 0 : index
    %c0_194 = arith.constant 0 : index
    %316 = vector.load %arg9[%c0_193, %c0_194] : memref<8x128xf32, #tpu.memory_space<vmem>>, vector<8x128xf32>
    %c15 = arith.constant 15 : index
    %c0_195 = arith.constant 0 : index
    %c0_196 = arith.constant 0 : index
    %317 = vector.load %arg1[%c15, %c0_195, %c0_196] : memref<18x8x144xbf16, #tpu.memory_space<vmem>>, vector<1x8x144xbf16>
    %318 = vector.shape_cast %317 : vector<1x8x144xbf16> to vector<8x144xbf16>
    %c0_197 = arith.constant 0 : index
    %c0_198 = arith.constant 0 : index
    %319 = vector.load %arg2[%c0_197, %c0_198] : memref<144x256xbf16, #tpu.memory_space<vmem>>, vector<144x256xbf16>
    %cst_199 = arith.constant dense<0.000000e+00> : vector<8x256xf32>
    %320 = tpu.matmul %318, %319, %cst_199 {dimension_numbers = #tpu.dot_dimension_numbers<[1], [0], [0], [1], [0, 0, 1, 1], [], []>} : vector<8x144xbf16>, vector<144x256xbf16>, vector<8x256xf32> -> vector<8x256xf32>
    %c0_200 = arith.constant 0 : index
    %c0_201 = arith.constant 0 : index
    %321 = vector.load %arg3[%c0_200, %c0_201] : memref<1x256xf32, #tpu.memory_space<vmem>>, vector<1x256xf32>
    %322 = vector.broadcast %321 : vector<1x256xf32> to vector<8x256xf32>
    %323 = arith.addf %320, %322 : vector<8x256xf32>
    %cst_202 = arith.constant 0.000000e+00 : f32
    %324 = vector.broadcast %cst_202 : f32 to vector<8x256xf32>
    %325 = arith.maximumf %323, %324 : vector<8x256xf32>
    %c15_203 = arith.constant 15 : index
    %326 = memref.load %arg4[%c15_203] : memref<36xf32, #tpu.memory_space<smem>>
    %327 = vector.extract_strided_slice %325 {offsets = [0, 0], sizes = [8, 128], strides = [1, 1]} : vector<8x256xf32> to vector<8x128xf32>
    %328 = vector.broadcast %326 : f32 to vector<8x128xf32>
    %329 = arith.mulf %328, %327 : vector<8x128xf32>
    %c33 = arith.constant 33 : index
    %330 = memref.load %arg4[%c33] : memref<36xf32, #tpu.memory_space<smem>>
    %331 = vector.extract_strided_slice %325 {offsets = [0, 128], sizes = [8, 128], strides = [1, 1]} : vector<8x256xf32> to vector<8x128xf32>
    %332 = vector.broadcast %330 : f32 to vector<8x128xf32>
    %333 = arith.mulf %332, %331 : vector<8x128xf32>
    %334 = arith.addf %329, %333 : vector<8x128xf32>
    %335 = arith.addf %316, %334 : vector<8x128xf32>
    %c0_204 = arith.constant 0 : index
    %c0_205 = arith.constant 0 : index
    %336 = vector.load %arg9[%c0_204, %c0_205] : memref<8x128xf32, #tpu.memory_space<vmem>>, vector<8x128xf32>
    tpu.vector_store %arg9[%c0_204, %c0_205], %335 {strides = array<i32>} : memref<8x128xf32, #tpu.memory_space<vmem>>, vector<8x128xf32>,
    %c0_206 = arith.constant 0 : index
    %c0_207 = arith.constant 0 : index
    %337 = vector.load %arg9[%c0_206, %c0_207] : memref<8x128xf32, #tpu.memory_space<vmem>>, vector<8x128xf32>
    %c16 = arith.constant 16 : index
    %c0_208 = arith.constant 0 : index
    %c0_209 = arith.constant 0 : index
    %338 = vector.load %arg1[%c16, %c0_208, %c0_209] : memref<18x8x144xbf16, #tpu.memory_space<vmem>>, vector<1x8x144xbf16>
    %339 = vector.shape_cast %338 : vector<1x8x144xbf16> to vector<8x144xbf16>
    %c0_210 = arith.constant 0 : index
    %c0_211 = arith.constant 0 : index
    %340 = vector.load %arg2[%c0_210, %c0_211] : memref<144x256xbf16, #tpu.memory_space<vmem>>, vector<144x256xbf16>
    %cst_212 = arith.constant dense<0.000000e+00> : vector<8x256xf32>
    %341 = tpu.matmul %339, %340, %cst_212 {dimension_numbers = #tpu.dot_dimension_numbers<[1], [0], [0], [1], [0, 0, 1, 1], [], []>} : vector<8x144xbf16>, vector<144x256xbf16>, vector<8x256xf32> -> vector<8x256xf32>
    %c0_213 = arith.constant 0 : index
    %c0_214 = arith.constant 0 : index
    %342 = vector.load %arg3[%c0_213, %c0_214] : memref<1x256xf32, #tpu.memory_space<vmem>>, vector<1x256xf32>
    %343 = vector.broadcast %342 : vector<1x256xf32> to vector<8x256xf32>
    %344 = arith.addf %341, %343 : vector<8x256xf32>
    %cst_215 = arith.constant 0.000000e+00 : f32
    %345 = vector.broadcast %cst_215 : f32 to vector<8x256xf32>
    %346 = arith.maximumf %344, %345 : vector<8x256xf32>
    %c16_216 = arith.constant 16 : index
    %347 = memref.load %arg4[%c16_216] : memref<36xf32, #tpu.memory_space<smem>>
    %348 = vector.extract_strided_slice %346 {offsets = [0, 0], sizes = [8, 128], strides = [1, 1]} : vector<8x256xf32> to vector<8x128xf32>
    %349 = vector.broadcast %347 : f32 to vector<8x128xf32>
    %350 = arith.mulf %349, %348 : vector<8x128xf32>
    %c34 = arith.constant 34 : index
    %351 = memref.load %arg4[%c34] : memref<36xf32, #tpu.memory_space<smem>>
    %352 = vector.extract_strided_slice %346 {offsets = [0, 128], sizes = [8, 128], strides = [1, 1]} : vector<8x256xf32> to vector<8x128xf32>
    %353 = vector.broadcast %351 : f32 to vector<8x128xf32>
    %354 = arith.mulf %353, %352 : vector<8x128xf32>
    %355 = arith.addf %350, %354 : vector<8x128xf32>
    %356 = arith.addf %337, %355 : vector<8x128xf32>
    %c0_217 = arith.constant 0 : index
    %c0_218 = arith.constant 0 : index
    %357 = vector.load %arg9[%c0_217, %c0_218] : memref<8x128xf32, #tpu.memory_space<vmem>>, vector<8x128xf32>
    tpu.vector_store %arg9[%c0_217, %c0_218], %356 {strides = array<i32>} : memref<8x128xf32, #tpu.memory_space<vmem>>, vector<8x128xf32>,
    %c0_219 = arith.constant 0 : index
    %c0_220 = arith.constant 0 : index
    %358 = vector.load %arg9[%c0_219, %c0_220] : memref<8x128xf32, #tpu.memory_space<vmem>>, vector<8x128xf32>
    %c17 = arith.constant 17 : index
    %c0_221 = arith.constant 0 : index
    %c0_222 = arith.constant 0 : index
    %359 = vector.load %arg1[%c17, %c0_221, %c0_222] : memref<18x8x144xbf16, #tpu.memory_space<vmem>>, vector<1x8x144xbf16>
    %360 = vector.shape_cast %359 : vector<1x8x144xbf16> to vector<8x144xbf16>
    %c0_223 = arith.constant 0 : index
    %c0_224 = arith.constant 0 : index
    %361 = vector.load %arg2[%c0_223, %c0_224] : memref<144x256xbf16, #tpu.memory_space<vmem>>, vector<144x256xbf16>
    %cst_225 = arith.constant dense<0.000000e+00> : vector<8x256xf32>
    %362 = tpu.matmul %360, %361, %cst_225 {dimension_numbers = #tpu.dot_dimension_numbers<[1], [0], [0], [1], [0, 0, 1, 1], [], []>} : vector<8x144xbf16>, vector<144x256xbf16>, vector<8x256xf32> -> vector<8x256xf32>
    %c0_226 = arith.constant 0 : index
    %c0_227 = arith.constant 0 : index
    %363 = vector.load %arg3[%c0_226, %c0_227] : memref<1x256xf32, #tpu.memory_space<vmem>>, vector<1x256xf32>
    %364 = vector.broadcast %363 : vector<1x256xf32> to vector<8x256xf32>
    %365 = arith.addf %362, %364 : vector<8x256xf32>
    %cst_228 = arith.constant 0.000000e+00 : f32
    %366 = vector.broadcast %cst_228 : f32 to vector<8x256xf32>
    %367 = arith.maximumf %365, %366 : vector<8x256xf32>
    %c17_229 = arith.constant 17 : index
    %368 = memref.load %arg4[%c17_229] : memref<36xf32, #tpu.memory_space<smem>>
    %369 = vector.extract_strided_slice %367 {offsets = [0, 0], sizes = [8, 128], strides = [1, 1]} : vector<8x256xf32> to vector<8x128xf32>
    %370 = vector.broadcast %368 : f32 to vector<8x128xf32>
    %371 = arith.mulf %370, %369 : vector<8x128xf32>
    %c35 = arith.constant 35 : index
    %372 = memref.load %arg4[%c35] : memref<36xf32, #tpu.memory_space<smem>>
    %373 = vector.extract_strided_slice %367 {offsets = [0, 128], sizes = [8, 128], strides = [1, 1]} : vector<8x256xf32> to vector<8x128xf32>
    %374 = vector.broadcast %372 : f32 to vector<8x128xf32>
    %375 = arith.mulf %374, %373 : vector<8x128xf32>
    %376 = arith.addf %371, %375 : vector<8x128xf32>
    %377 = arith.addf %358, %376 : vector<8x128xf32>
    %c0_230 = arith.constant 0 : index
    %c0_231 = arith.constant 0 : index
    %378 = vector.load %arg9[%c0_230, %c0_231] : memref<8x128xf32, #tpu.memory_space<vmem>>, vector<8x128xf32>
    tpu.vector_store %arg9[%c0_230, %c0_231], %377 {strides = array<i32>} : memref<8x128xf32, #tpu.memory_space<vmem>>, vector<8x128xf32>,
    %c0_232 = arith.constant 0 : index
    %c0_233 = arith.constant 0 : index
    %379 = vector.load %arg9[%c0_232, %c0_233] : memref<8x128xf32, #tpu.memory_space<vmem>>, vector<8x128xf32>
    %cst_234 = arith.constant 0.000000e+00 : f32
    %380 = vector.broadcast %cst_234 : f32 to vector<8x128xf32>
    %381 = arith.maximumf %379, %380 : vector<8x128xf32>
    %c0_235 = arith.constant 0 : index
    %c0_236 = arith.constant 0 : index
    %382 = vector.load %arg6[%c0_235, %c0_236] : memref<128x128xf32, #tpu.memory_space<vmem>>, vector<128x128xf32>
    %cst_237 = arith.constant dense<0.000000e+00> : vector<8x128xf32>
    %383 = tpu.matmul %381, %382, %cst_237 {dimension_numbers = #tpu.dot_dimension_numbers<[1], [0], [0], [1], [0, 0, 1, 1], [], []>} : vector<8x128xf32>, vector<128x128xf32>, vector<8x128xf32> -> vector<8x128xf32>
    %c0_238 = arith.constant 0 : index
    %c0_239 = arith.constant 0 : index
    %384 = vector.load %arg7[%c0_238, %c0_239] : memref<1x128xf32, #tpu.memory_space<vmem>>, vector<1x128xf32>
    %385 = vector.broadcast %384 : vector<1x128xf32> to vector<8x128xf32>
    %386 = arith.addf %383, %385 : vector<8x128xf32>
    %cst_240 = arith.constant dense<0xFF800000> : vector<8xf32>
    %387 = vector.multi_reduction <maximumf>, %386, %cst_240 [1] : vector<8x128xf32> to vector<8xf32>
    %388 = vector.shape_cast %387 : vector<8xf32> to vector<8x1xf32>
    %389 = vector.broadcast %388 : vector<8x1xf32> to vector<8x128xf32>
    %390 = arith.subf %386, %389 : vector<8x128xf32>
    %391 = math.exp %390 : vector<8x128xf32>
    %cst_241 = arith.constant dense<0.000000e+00> : vector<8xf32>
    %392 = vector.multi_reduction <add>, %391, %cst_241 [1] : vector<8x128xf32> to vector<8xf32>
    %393 = vector.shape_cast %392 : vector<8xf32> to vector<8x1xf32>
    %394 = math.log %393 : vector<8x1xf32>
    %395 = vector.broadcast %394 : vector<8x1xf32> to vector<8x128xf32>
    %396 = arith.subf %390, %395 : vector<8x128xf32>
    %c0_242 = arith.constant 0 : index
    %c0_243 = arith.constant 0 : index
    %397 = vector.load %arg8[%c0_242, %c0_243] : memref<8x128xf32, #tpu.memory_space<vmem>>, vector<8x128xf32>
    tpu.vector_store %arg8[%c0_242, %c0_243], %396 {strides = array<i32>} : memref<8x128xf32, #tpu.memory_space<vmem>>, vector<8x128xf32>,
    return
  }
  func.func @transform_0(%arg0: i32) -> (i32, i32, i32) {
    %c0_i32 = arith.constant 0 : i32
    %c0_i32_0 = arith.constant 0 : i32
    %c0_i32_1 = arith.constant 0 : i32
    return %c0_i32, %arg0, %c0_i32_0 : i32, i32, i32
  }
  func.func @transform_1(%arg0: i32) -> (i32, i32) {
    %c0_i32 = arith.constant 0 : i32
    %c0_i32_0 = arith.constant 0 : i32
    %c0_i32_1 = arith.constant 0 : i32
    return %c0_i32, %c0_i32_0 : i32, i32
  }
  func.func @transform_2(%arg0: i32) -> (i32, i32) {
    %c0_i32 = arith.constant 0 : i32
    %c0_i32_0 = arith.constant 0 : i32
    %c0_i32_1 = arith.constant 0 : i32
    return %c0_i32, %c0_i32_0 : i32, i32
  }
  func.func @transform_3(%arg0: i32) -> i32 {
    %c0_i32 = arith.constant 0 : i32
    %c0_i32_0 = arith.constant 0 : i32
    return %c0_i32 : i32
  }
  func.func @transform_4(%arg0: i32) -> i32 {
    %c0_i32 = arith.constant 0 : i32
    %c0_i32_0 = arith.constant 0 : i32
    return %c0_i32 : i32
  }
  func.func @transform_5(%arg0: i32) -> (i32, i32) {
    %c0_i32 = arith.constant 0 : i32
    %c0_i32_0 = arith.constant 0 : i32
    %c0_i32_1 = arith.constant 0 : i32
    return %c0_i32, %c0_i32_0 : i32, i32
  }
  func.func @transform_6(%arg0: i32) -> (i32, i32) {
    %c0_i32 = arith.constant 0 : i32
    %c0_i32_0 = arith.constant 0 : i32
    %c0_i32_1 = arith.constant 0 : i32
    return %c0_i32, %c0_i32_0 : i32, i32
  }
  func.func @transform_7(%arg0: i32) -> (i32, i32) {
    %c0_i32 = arith.constant 0 : i32
    %c0_i32_0 = arith.constant 0 : i32
    return %arg0, %c0_i32 : i32, i32
  }
}

</mosaic_0001>

<bundles_post_ra>
// kernel: tpu_custom_call.1
= control target key start
LH: loop header
LB: loop body
LE: loop exit
PB: predicated region body
PF: predicated region fallthrough
CT: control target
= control target key end

     0   :  { %13 = vsyncpa [#allocation5], 0  ;;  %s4914_s0 = inlined_call_operand.hbm [shape: bf16[18,8,144], index: 0, kind: input, shape index: {}]   ;;  %s4915_s1 = inlined_call_operand.hbm [shape: bf16[144,256], index: 1, kind: input, shape index: {}]   ;;  %s4916_s2 = inlined_call_operand.vmem [shape: f32[1,256], index: 2, kind: input, shape index: {}]   ;;  %s4917_s3 = inlined_call_operand.vmem [shape: f32[36], index: 3, kind: input, shape index: {}]   ;;  %s4918_s4 = inlined_call_operand.<no memory space> [shape: f32[1], index: 4, kind: input, shape index: {}]   ;;  %s4919_s5 = inlined_call_operand.hbm [shape: f32[128,128], index: 5, kind: input, shape index: {}]   ;;  %s4920_s6 = inlined_call_operand.vmem [shape: f32[1,128], index: 6, kind: input, shape index: {}]   ;;  %s4921_s7 = inlined_call_operand.hbm [shape: f32[8,128], index: 7, kind: output, shape index: {}]  }
   0x1   :  { %14 = vsyncpa [#allocation9], 0 }
   0x2   :  { %15 = vsyncpa [#allocation7], 0 }
   0x3   :  { %16 = vsyncpa [#allocation6], 0  ;;  %s4190_s24 = smov [#allocation8]   ;;  %s4191_s26 = smov [#allocation4]  }
   0x4   :  { %s34_s25 = sshll.u32 %s4190_s24, 4  ;;  %s22_s27 = sshll.u32 %s4191_s26, 4  ;;  %s35_s25 = int_to_ptr.vmem [resolvable:$true] %s34_s25  ;;  %s23_s27 = int_to_ptr.vmem [resolvable:$true] %s22_s27 }
   0x5   :  { %s4096_s28 = scalar_lea.vmem %s35_s25, 2304  ;;  %p4101_p1 = scmp.lt.s32.totalorder %s35_s25, %s35_s25 }
   0x6   :  { %p4097_p0 = scmp.ne.s32.totalorder %s35_s25, %s4096_s28  ;;  %p4102_p2 = scmp.lt.s32.totalorder %s4096_s28, %s4096_s28 }
   0x8   :  { %p4103_p3 = por %p4102_p2, %p4101_p1 }
   0xa   :  { %p4104_p4 = pnand %p4103_p3, %p4097_p0 }
   0xc   :  { %4107 = shalt.err (!%p4104_p4)
}
   0xd   :  { %s4192_s29 = smov 128   ;;  %s4193_s30 = smov 8  }
   0xe   :  { %40 = dma.hbm_to_vmem [thread:$0]  %s4915_s1, 2304, %s35_s25, [#allocation9], %s4192_s29, %s4192_s29, %s4193_s30  }
   0xf   :  { %s4116_s10 = scalar_lea.vmem %s23_s27, 2304  ;;  %p4121_p6 = scmp.lt.s32.totalorder %s23_s27, %s23_s27 }
  0x10   :  { %p4117_p5 = scmp.ne.s32.totalorder %s23_s27, %s4116_s10  ;;  %p4122_p7 = scmp.lt.s32.totalorder %s4116_s10, %s4116_s10 }
  0x12   :  { %p4123_p8 = por %p4122_p7, %p4121_p6 }
  0x14   :  { %p4124_p9 = pnand %p4123_p8, %p4117_p5 }
  0x16   :  { %4127 = shalt.err (!%p4124_p9)
}
  0x17   :  { %28 = dma.hbm_to_vmem [thread:$0]  %s4914_s0, 2304, %s23_s27, [#allocation5], %s4192_s29, %s4192_s29, %s4193_s30  }
  0x18   :  { %s49_s15 = sshll.u32 %s4917_s3, 4  ;;  %s50_s15 = int_to_ptr.vmem [resolvable:$true] %s49_s15 }
  0x19   :  { %s4128_s1 = scalar_lea.vmem %s50_s15, 16  ;;  %p4133_p11 = scmp.lt.s32.totalorder %s50_s15, %s50_s15 }
  0x1a   :  { %p4129_p10 = scmp.ne.s32.totalorder %s50_s15, %s4128_s1  ;;  %p4134_p12 = scmp.lt.s32.totalorder %s4128_s1, %s4128_s1 }
  0x1c   :  { %p4135_p13 = por %p4134_p12, %p4133_p11 }
  0x1e   :  { %p4136_p0 = pnand %p4135_p13, %p4129_p10 }
  0x20   :  { %4139 = shalt.err (!%p4136_p0)
}
  0x21   :  { %s4194_s16 = smov [#allocation10]   ;;  %s4195_s17 = smov [#allocation11]  }
  0x22   :  { %52 = dma.vmem_to_smem %s50_s15, 16, %s4194_s16, [#allocation7]  }
  0x23   :  { %s60_s18 = sshll.u32 %s4195_s17, 4  ;;  %s61_s18 = int_to_ptr.vmem [resolvable:$true] %s60_s18 }
  0x24   :  { %s4148_s19 = scalar_lea.vmem %s61_s18, 2048  ;;  %p4153_p2 = scmp.lt.s32.totalorder %s61_s18, %s61_s18 }
  0x25   :  { %p4149_p1 = scmp.ne.s32.totalorder %s61_s18, %s4148_s19  ;;  %p4154_p3 = scmp.lt.s32.totalorder %s4148_s19, %s4148_s19 }
  0x27   :  { %p4155_p4 = por %p4154_p3, %p4153_p2 }
  0x29   :  { %p4156_p5 = pnand %p4155_p4, %p4149_p1 }
  0x2b   :  { %4159 = shalt.err (!%p4156_p5)
}
  0x2c   :  { %66 = dma.hbm_to_vmem [thread:$0]  %s4919_s5, 2048, %s61_s18, [#allocation9], %s4192_s29, %s4192_s29, %s4193_s30  }
  0x2d   :  { %4180 = dma.done.wait [#allocation5], 2304  }
  0x2e   :  { %4181 = vsyncadd [#allocation5], 4294964992 }
  0x2f   :  { %4182 = dma.done.wait [#allocation9], 2304  }
  0x30   :  { %4183 = vsyncadd [#allocation9], 4294964992 }
  0x31   :  { %4184 = dma.done.wait [#allocation7], 16  }
  0x32   :  { %4185 = vsyncadd [#allocation7], 4294967280 }
  0x33   :  { %4186 = dma.done.wait [#allocation9], 2048  }
  0x34   :  { %4187 = vsyncadd [#allocation9], 4294965248 }
  0x35   :  { %81 = sfence }
  0x36   :  { %v4260_v0 = vld [vmem:[#allocation8 + $0x74] ss:$8 sps:$4 sm:$0xff]   ;;  %v4262_v1 = vld [vmem:[#allocation8 + $0x70] ss:$8 sps:$4 sm:$0xff]   ;;  %v4266_v2 = vld [vmem:[#allocation8 + $0x64] ss:$8 sps:$4 sm:$0xff]  }
  0x37   :  { %214 = vmatprep.subr.bf16.mxu0 %v4260_v0  ;;  %400 = vmatprep.subr.bf16.mxu1 %v4260_v0  ;;  %v4270_v3 = vld [vmem:[#allocation8 + $0x60] ss:$8 sps:$4 sm:$0xff]   ;;  %v4274_v4 = vld [vmem:[#allocation8 + $0x54] ss:$8 sps:$4 sm:$0xff]   ;;  %v4278_v5 = vld [vmem:[#allocation8 + $0x50] ss:$8 sps:$4 sm:$0xff]  }
  0x38   :  { %215 = vmatpush1.bf16.msra.mxu0 %v4262_v1  ;;  %401 = vmatpush1.bf16.msra.mxu1 %v4262_v1  ;;  %v4282_v6 = vld [vmem:[#allocation8 + $0x44] ss:$8 sps:$4 sm:$0xff]   ;;  %v4286_v7 = vld [vmem:[#allocation8 + $0x40] ss:$8 sps:$4 sm:$0xff]   ;;  %v4290_v8 = vld [vmem:[#allocation8 + $0x34] ss:$8 sps:$4 sm:$0xff]  }
  0x39   :  { %216 = vmatprep.subr.bf16.mxu0 %v4266_v2  ;;  %402 = vmatprep.subr.bf16.mxu1 %v4266_v2  ;;  %v83_v9 = vld [vmem:[#allocation4] sm:$0xff]  ;;  %v270_v10 = vld [vmem:[#allocation4 + $0x8] sm:$0xff]  ;;  %v4294_v14 = vld [vmem:[#allocation8 + $0x24] ss:$8 sps:$4 sm:$0xff]   ;;  %vm210_vm0 = vcmask 130048   ;;  %s4592_s5 = sld [smem:[#allocation10]] }
  0x3a   :  { %v3520_v11 = vcombine.high %v83_v9, %v83_v9  ;;  %v3542_v12 = vcombine.high %v270_v10, %v270_v10  ;;  %v4292_v13 = vld [vmem:[#allocation8 + $0x30] ss:$8 sps:$4 sm:$0xff]   ;;  %v4300_v15 = vld [vmem:[#allocation8 + $0x20] ss:$8 sps:$4 sm:$0xff]   ;;  %v4308_v16 = vld [vmem:[#allocation8 + $0x14] ss:$8 sps:$4 sm:$0xff]   ;;  %v3519_v22 = vcombine.low %v83_v9, %v83_v9  ;;  %v3541_v23 = vcombine.low %v270_v10, %v270_v10 }
  0x3b   :  { %v4312_v17 = vld [vmem:[#allocation8 + $0x10] ss:$8 sps:$4 sm:$0xff]   ;;  %v4316_v18 = vld [vmem:[#allocation8 + $0x4] ss:$8 sps:$4 sm:$0xff]   ;;  %v4320_v19 = vld [vmem:[#allocation8] ss:$8 sps:$4 sm:$0xff]   ;;  %v104_v10 = vlaneseq }
  0x3c   :  { %217 = vmatpush1.bf16.msra.mxu0 %v4270_v3  ;;  %403 = vmatpush1.bf16.msra.mxu1 %v4270_v3  ;;  %v4324_v20 = vld [vmem:[#allocation8 + $0x84] ss:$8 sps:$4 sm:$0xff]   ;;  %v4328_v21 = vld [vmem:[#allocation8 + $0x80] ss:$8 sps:$4 sm:$0xff]   ;;  %v822_v30 = vld [vmem:[#allocation4 + $0x20] sm:$0xff]  ;;  %s4602_s24 = sld [smem:[#allocation10 + $0x1]] }
  0x3d   :  { %218 = vmatprep.subr.bf16.mxu0 %v4274_v4  ;;  %404 = vmatprep.subr.bf16.mxu1 %v4274_v4  ;;  %v454_v24 = vld [vmem:[#allocation4 + $0x10] sm:$0xff]  ;;  %v638_v25 = vld [vmem:[#allocation4 + $0x18] sm:$0xff]  ;;  %v1006_v31 = vld [vmem:[#allocation4 + $0x28] sm:$0xff]  ;;  %v3611_v32 = vcombine.high %v822_v30, %v822_v30  ;;  %v3610_v34 = vcombine.low %v822_v30, %v822_v30  ;;  %s4606_s25 = sld [smem:[#allocation10 + $0x12]]  ;;  %vm4197_vm1 = vmmov 0  }
  0x3e   :  { %3539 = vmatprep.mubr.msk.bf16.mxu0 %vm210_vm0, %v3520_v11  ;;  %3561 = vmatprep.mubr.msk.bf16.mxu1 %vm210_vm0, %v3542_v12  ;;  %v3565_v26 = vcombine.high %v454_v24, %v454_v24  ;;  %v3588_v27 = vcombine.high %v638_v25, %v638_v25  ;;  %v3564_v28 = vcombine.low %v454_v24, %v454_v24  ;;  %v1190_v36 = vld [vmem:[#allocation4 + $0x30] sm:$0xff]  ;;  %v1374_v37 = vld [vmem:[#allocation4 + $0x38] sm:$0xff]  ;;  %v1558_v42 = vld [vmem:[#allocation4 + $0x40] sm:$0xff]  ;;  %s4608_s26 = sld [smem:[#allocation10 + $0x13]] }
  0x3f   :  { %v3587_v29 = vcombine.low %v638_v25, %v638_v25  ;;  %v3634_v33 = vcombine.high %v1006_v31, %v1006_v31  ;;  %v3633_v35 = vcombine.low %v1006_v31, %v1006_v31  ;;  %v3657_v38 = vcombine.high %v1190_v36, %v1190_v36  ;;  %v1742_v43 = vld [vmem:[#allocation4 + $0x48] sm:$0xff]  ;;  %v4486_v49 = vld [vmem:[#allocation4 + $0x50] sm:$0xff]  ;;  %v4488_v50 = vld [vmem:[#allocation4 + $0x58] sm:$0xff]  ;;  %s4681_s10 = sld [smem:[#allocation10 + $0x3]] }
  0x40   :  { %219 = vmatpush1.bf16.msra.mxu0 %v4278_v5  ;;  %405 = vmatpush1.bf16.msra.mxu1 %v4278_v5  ;;  %v3680_v39 = vcombine.high %v1374_v37, %v1374_v37  ;;  %v3656_v40 = vcombine.low %v1190_v36, %v1190_v36  ;;  %v3679_v41 = vcombine.low %v1374_v37, %v1374_v37  ;;  %v4484_v46 = vld [vmem:[#allocation8 + $0x74] ss:$8 sps:$4 sm:$0xff]   ;;  %v4492_v51 = vld [vmem:[#allocation8 + $0x70] ss:$8 sps:$4 sm:$0xff]   ;;  %v4496_v52 = vld [vmem:[#allocation8 + $0x64] ss:$8 sps:$4 sm:$0xff]  }
  0x41   :  { %220 = vmatprep.subr.bf16.mxu0 %v4282_v6  ;;  %406 = vmatprep.subr.bf16.mxu1 %v4282_v6  ;;  %v3703_v44 = vcombine.high %v1558_v42, %v1558_v42  ;;  %v3726_v45 = vcombine.high %v1742_v43, %v1742_v43  ;;  %v3702_v47 = vcombine.low %v1558_v42, %v1558_v42  ;;  %v4504_v55 = vld [vmem:[#allocation8 + $0x60] ss:$8 sps:$4 sm:$0xff]   ;;  %v4508_v56 = vld [vmem:[#allocation8 + $0x54] ss:$8 sps:$4 sm:$0xff]   ;;  %v4514_v57 = vld [vmem:[#allocation8 + $0x50] ss:$8 sps:$4 sm:$0xff]  }
  0x42   :  { %v3725_v48 = vcombine.low %v1742_v43, %v1742_v43  ;;  %v3749_v53 = vcombine.high %v4486_v49, %v4486_v49  ;;  %v3772_v54 = vcombine.high %v4488_v50, %v4488_v50  ;;  %v4518_v58 = vld [vmem:[#allocation8 + $0x44] ss:$8 sps:$4 sm:$0xff]   ;;  %v4522_v59 = vld [vmem:[#allocation8 + $0x40] ss:$8 sps:$4 sm:$0xff]   ;;  %v4526_v60 = vld [vmem:[#allocation8 + $0x34] ss:$8 sps:$4 sm:$0xff]  }
  0x43   :  { %v4530_v61 = vld [vmem:[#allocation8 + $0x30] ss:$8 sps:$4 sm:$0xff]   ;;  %v4534_v62 = vld [vmem:[#allocation8 + $0x24] ss:$8 sps:$4 sm:$0xff]   ;;  %v4538_v63 = vld [vmem:[#allocation8 + $0x20] ss:$8 sps:$4 sm:$0xff]  }
  0x44   :  { %221 = vmatpush1.bf16.msra.mxu0 %v4286_v7  ;;  %407 = vmatpush1.bf16.msra.mxu1 %v4286_v7  ;;  %v4572_v9 = vld [vmem:[#allocation4 + $0x68] sm:$0xff]  ;;  %s4683_s11 = sld [smem:[#allocation10 + $0x14]] }
  0x45   :  { %222 = vmatprep.subr.bf16.mxu0 %v4290_v8  ;;  %408 = vmatprep.subr.bf16.mxu1 %v4290_v8  ;;  %v3818_v12 = vcombine.high %v4572_v9, %v4572_v9  ;;  %s4685_s12 = sld [smem:[#allocation10 + $0x15]] }
  0x46   :  { %s4746_s13 = sld [smem:[#allocation10 + $0x4]] }
  0x47   :  { %s4756_s17 = sld [smem:[#allocation10 + $0x5]] }
  0x48   :  { %223 = vmatpush1.bf16.msra.mxu0 %v4292_v13  ;;  %409 = vmatpush1.bf16.msra.mxu1 %v4292_v13  ;;  %s4758_s18 = sld [smem:[#allocation10 + $0x16]] }
  0x49   :  { %224 = vmatprep.subr.bf16.mxu0 %v4294_v14  ;;  %410 = vmatprep.subr.bf16.mxu1 %v4294_v14  ;;  %s4760_s19 = sld [smem:[#allocation10 + $0x17]] }
  0x4a   :  { %s3677_s0 = sld [smem:[#allocation10 + $0x6]] }
  0x4b   :  { %s3700_s22 = sld [smem:[#allocation10 + $0x7]] }
  0x4c   :  { %225 = vmatpush1.bf16.msra.mxu0 %v4300_v15  ;;  %411 = vmatpush1.bf16.msra.mxu1 %v4300_v15  ;;  %s3678_s23 = sld [smem:[#allocation10 + $0x18]] }
  0x4d   :  { %226 = vmatprep.subr.bf16.mxu0 %v4308_v16  ;;  %412 = vmatprep.subr.bf16.mxu1 %v4308_v16  ;;  %s4814_s27 = sld [smem:[#allocation10 + $0x8]] }
  0x4e   :  { %s4819_s29 = sld [smem:[#allocation10 + $0x9]] }
  0x4f   :  { %s4822_s30 = sld [smem:[#allocation10 + $0x1a]] }
  0x50   :  { %227 = vmatpush1.bf16.msra.mxu0 %v4312_v17  ;;  %413 = vmatpush1.bf16.msra.mxu1 %v4312_v17  ;;  %s4824_s8 = sld [smem:[#allocation10 + $0x1b]] }
  0x51   :  { %228 = vmatprep.subr.bf16.mxu0 %v4316_v18  ;;  %414 = vmatprep.subr.bf16.mxu1 %v4316_v18  ;;  %s4849_s9 = sld [smem:[#allocation10 + $0xa]] }
  0x52   :  { %s3792_s14 = sld [smem:[#allocation10 + $0xb]] }
  0x53   :  { %s3770_s15 = sld [smem:[#allocation10 + $0x1c]] }
  0x54   :  { %229 = vmatpush1.bf16.msra.mxu0 %v4320_v19  ;;  %415 = vmatpush1.bf16.msra.mxu1 %v4320_v19  ;;  %s3793_s1 = sld [smem:[#allocation10 + $0x1d]] }
  0x55   :  { %244 = vmatprep.subr.bf16.mxu0 %v4324_v20  ;;  %430 = vmatprep.subr.bf16.mxu1 %v4324_v20  ;;  %s3815_s16 = sld [smem:[#allocation10 + $0xc]] }
  0x56   :  { %s3838_s3 = sld [smem:[#allocation10 + $0xd]] }
  0x57   :  { %s3839_s20 = sld [smem:[#allocation10 + $0x1f]] }
  0x58   :  { %245 = vmatpush2.bf16.msra.mxu0 %v4328_v21  ;;  %431 = vmatpush2.bf16.msra.mxu1 %v4328_v21  ;;  %s3885_s28 = sld [smem:[#allocation10 + $0x21]] }
  0x59   :  { %584 = vmatprep.subr.bf16.mxu0 %v4260_v0  ;;  %768 = vmatprep.subr.bf16.mxu1 %v4260_v0 }
  0x5b   :  { %247 = vmatmul.mubr.bf16.vlgmr.msra.gmra.mxu0 %v3519_v22  ;;  %433 = vmatmul.mubr.bf16.vlgmr.msra.gmra.mxu1 %v3541_v23 }
  0x5c   :  { %585 = vmatpush1.bf16.msra.mxu0 %v4262_v1  ;;  %769 = vmatpush1.bf16.msra.mxu1 %v4262_v1 }
  0x5d   :  { %586 = vmatprep.subr.bf16.mxu0 %v4266_v2  ;;  %770 = vmatprep.subr.bf16.mxu1 %v4266_v2 }
  0x5e   :  { %3584 = vmatprep.mubr.msk.bf16.mxu0 %vm210_vm0, %v3565_v26  ;;  %3607 = vmatprep.mubr.msk.bf16.mxu1 %vm210_vm0, %v3588_v27  ;;  %v258_v26 = vstv %s4592_s5  ;;  %v444_v27 = vstv %s4602_s24  ;;  %s3701_s24 = sld [smem:[#allocation10 + $0x19]] }
  0x5f   :  { %s3816_s5 = sld [smem:[#allocation10 + $0x1e]] }
  0x60   :  { %587 = vmatpush1.bf16.msra.mxu0 %v4270_v3  ;;  %771 = vmatpush1.bf16.msra.mxu1 %v4270_v3 }
  0x61   :  { %588 = vmatprep.subr.bf16.mxu0 %v4274_v4  ;;  %772 = vmatprep.subr.bf16.mxu1 %v4274_v4 }
  0x64   :  { %589 = vmatpush1.bf16.msra.mxu0 %v4278_v5  ;;  %773 = vmatpush1.bf16.msra.mxu1 %v4278_v5 }
  0x65   :  { %590 = vmatprep.subr.bf16.mxu0 %v4282_v6  ;;  %774 = vmatprep.subr.bf16.mxu1 %v4282_v6 }
  0x68   :  { %591 = vmatpush1.bf16.msra.mxu0 %v4286_v7  ;;  %775 = vmatpush1.bf16.msra.mxu1 %v4286_v7 }
  0x69   :  { %592 = vmatprep.subr.bf16.mxu0 %v4290_v8  ;;  %776 = vmatprep.subr.bf16.mxu1 %v4290_v8 }
  0x6c   :  { %593 = vmatpush1.bf16.msra.mxu0 %v4292_v13  ;;  %777 = vmatpush1.bf16.msra.mxu1 %v4292_v13 }
  0x6d   :  { %594 = vmatprep.subr.bf16.mxu0 %v4294_v14  ;;  %778 = vmatprep.subr.bf16.mxu1 %v4294_v14 }
  0x70   :  { %595 = vmatpush1.bf16.msra.mxu0 %v4300_v15  ;;  %779 = vmatpush1.bf16.msra.mxu1 %v4300_v15 }
  0x71   :  { %596 = vmatprep.subr.bf16.mxu0 %v4308_v16  ;;  %780 = vmatprep.subr.bf16.mxu1 %v4308_v16 }
  0x74   :  { %597 = vmatpush1.bf16.msra.mxu0 %v4312_v17  ;;  %781 = vmatpush1.bf16.msra.mxu1 %v4312_v17 }
  0x75   :  { %598 = vmatprep.subr.bf16.mxu0 %v4316_v18  ;;  %782 = vmatprep.subr.bf16.mxu1 %v4316_v18 }
  0x78   :  { %599 = vmatpush1.bf16.msra.mxu0 %v4320_v19  ;;  %783 = vmatpush1.bf16.msra.mxu1 %v4320_v19 }
  0x79   :  { %614 = vmatprep.subr.bf16.mxu0 %v4324_v20  ;;  %798 = vmatprep.subr.bf16.mxu1 %v4324_v20 }
  0x7c   :  { %615 = vmatpush2.bf16.msra.mxu0 %v4328_v21  ;;  %799 = vmatpush2.bf16.msra.mxu1 %v4328_v21 }
  0x7d   :  { %952 = vmatprep.subr.bf16.mxu0 %v4260_v0  ;;  %1136 = vmatprep.subr.bf16.mxu1 %v4260_v0 }
  0x7f   :  { %617 = vmatmul.mubr.bf16.vlgmr.msra.gmra.mxu0 %v3564_v28  ;;  %801 = vmatmul.mubr.bf16.vlgmr.msra.gmra.mxu1 %v3587_v29 }
  0x80   :  { %953 = vmatpush1.bf16.msra.mxu0 %v4262_v1  ;;  %1137 = vmatpush1.bf16.msra.mxu1 %v4262_v1 }
  0x81   :  { %954 = vmatprep.subr.bf16.mxu0 %v4266_v2  ;;  %1138 = vmatprep.subr.bf16.mxu1 %v4266_v2 }
  0x82   :  { %3630 = vmatprep.mubr.msk.bf16.mxu0 %vm210_vm0, %v3611_v32  ;;  %3653 = vmatprep.mubr.msk.bf16.mxu1 %vm210_vm0, %v3634_v33 }
  0x84   :  { %955 = vmatpush1.bf16.msra.mxu0 %v4270_v3  ;;  %1139 = vmatpush1.bf16.msra.mxu1 %v4270_v3 }
  0x85   :  { %956 = vmatprep.subr.bf16.mxu0 %v4274_v4  ;;  %1140 = vmatprep.subr.bf16.mxu1 %v4274_v4 }
  0x88   :  { %957 = vmatpush1.bf16.msra.mxu0 %v4278_v5  ;;  %1141 = vmatpush1.bf16.msra.mxu1 %v4278_v5 }
  0x89   :  { %958 = vmatprep.subr.bf16.mxu0 %v4282_v6  ;;  %1142 = vmatprep.subr.bf16.mxu1 %v4282_v6 }
  0x8c   :  { %959 = vmatpush1.bf16.msra.mxu0 %v4286_v7  ;;  %1143 = vmatpush1.bf16.msra.mxu1 %v4286_v7 }
  0x8d   :  { %960 = vmatprep.subr.bf16.mxu0 %v4290_v8  ;;  %1144 = vmatprep.subr.bf16.mxu1 %v4290_v8 }
  0x90   :  { %961 = vmatpush1.bf16.msra.mxu0 %v4292_v13  ;;  %1145 = vmatpush1.bf16.msra.mxu1 %v4292_v13 }
  0x91   :  { %962 = vmatprep.subr.bf16.mxu0 %v4294_v14  ;;  %1146 = vmatprep.subr.bf16.mxu1 %v4294_v14 }
  0x94   :  { %963 = vmatpush1.bf16.msra.mxu0 %v4300_v15  ;;  %1147 = vmatpush1.bf16.msra.mxu1 %v4300_v15 }
  0x95   :  { %964 = vmatprep.subr.bf16.mxu0 %v4308_v16  ;;  %1148 = vmatprep.subr.bf16.mxu1 %v4308_v16 }
  0x98   :  { %965 = vmatpush1.bf16.msra.mxu0 %v4312_v17  ;;  %1149 = vmatpush1.bf16.msra.mxu1 %v4312_v17 }
  0x99   :  { %966 = vmatprep.subr.bf16.mxu0 %v4316_v18  ;;  %1150 = vmatprep.subr.bf16.mxu1 %v4316_v18 }
  0x9c   :  { %967 = vmatpush1.bf16.msra.mxu0 %v4320_v19  ;;  %1151 = vmatpush1.bf16.msra.mxu1 %v4320_v19 }
  0x9d   :  { %982 = vmatprep.subr.bf16.mxu0 %v4324_v20  ;;  %1166 = vmatprep.subr.bf16.mxu1 %v4324_v20 }
  0xa0   :  { %983 = vmatpush2.bf16.msra.mxu0 %v4328_v21  ;;  %1167 = vmatpush2.bf16.msra.mxu1 %v4328_v21 }
  0xa1   :  { %1320 = vmatprep.subr.bf16.mxu0 %v4260_v0  ;;  %1504 = vmatprep.subr.bf16.mxu1 %v4260_v0 }
  0xa3   :  { %985 = vmatmul.mubr.bf16.vlgmr.msra.gmra.mxu0 %v3610_v34  ;;  %1169 = vmatmul.mubr.bf16.vlgmr.msra.gmra.mxu1 %v3633_v35  ;;  %v261_v34 = vstv %s4606_s25  ;;  %v447_v35 = vstv %s4608_s26  ;;  %s3862_s26 = sld [smem:[#allocation10 + $0x20]] }
  0xa4   :  { %1321 = vmatpush1.bf16.msra.mxu0 %v4262_v1  ;;  %1505 = vmatpush1.bf16.msra.mxu1 %v4262_v1 }
  0xa5   :  { %1322 = vmatprep.subr.bf16.mxu0 %v4266_v2  ;;  %1506 = vmatprep.subr.bf16.mxu1 %v4266_v2 }
  0xa6   :  { %3676 = vmatprep.mubr.msk.bf16.mxu0 %vm210_vm0, %v3657_v38  ;;  %3699 = vmatprep.mubr.msk.bf16.mxu1 %vm210_vm0, %v3680_v39 }
  0xa8   :  { %1323 = vmatpush1.bf16.msra.mxu0 %v4270_v3  ;;  %1507 = vmatpush1.bf16.msra.mxu1 %v4270_v3 }
  0xa9   :  { %1324 = vmatprep.subr.bf16.mxu0 %v4274_v4  ;;  %1508 = vmatprep.subr.bf16.mxu1 %v4274_v4 }
  0xac   :  { %1325 = vmatpush1.bf16.msra.mxu0 %v4278_v5  ;;  %1509 = vmatpush1.bf16.msra.mxu1 %v4278_v5 }
  0xad   :  { %1326 = vmatprep.subr.bf16.mxu0 %v4282_v6  ;;  %1510 = vmatprep.subr.bf16.mxu1 %v4282_v6 }
  0xb0   :  { %1327 = vmatpush1.bf16.msra.mxu0 %v4286_v7  ;;  %1511 = vmatpush1.bf16.msra.mxu1 %v4286_v7 }
  0xb1   :  { %1328 = vmatprep.subr.bf16.mxu0 %v4290_v8  ;;  %1512 = vmatprep.subr.bf16.mxu1 %v4290_v8 }
  0xb4   :  { %1329 = vmatpush1.bf16.msra.mxu0 %v4292_v13  ;;  %1513 = vmatpush1.bf16.msra.mxu1 %v4292_v13 }
  0xb5   :  { %1330 = vmatprep.subr.bf16.mxu0 %v4294_v14  ;;  %1514 = vmatprep.subr.bf16.mxu1 %v4294_v14 }
  0xb8   :  { %1331 = vmatpush1.bf16.msra.mxu0 %v4300_v15  ;;  %1515 = vmatpush1.bf16.msra.mxu1 %v4300_v15 }
  0xb9   :  { %1332 = vmatprep.subr.bf16.mxu0 %v4308_v16  ;;  %1516 = vmatprep.subr.bf16.mxu1 %v4308_v16 }
  0xbc   :  { %1333 = vmatpush1.bf16.msra.mxu0 %v4312_v17  ;;  %1517 = vmatpush1.bf16.msra.mxu1 %v4312_v17 }
  0xbd   :  { %1334 = vmatprep.subr.bf16.mxu0 %v4316_v18  ;;  %1518 = vmatprep.subr.bf16.mxu1 %v4316_v18 }
  0xc0   :  { %1335 = vmatpush1.bf16.msra.mxu0 %v4320_v19  ;;  %1519 = vmatpush1.bf16.msra.mxu1 %v4320_v19 }
  0xc1   :  { %1350 = vmatprep.subr.bf16.mxu0 %v4324_v20  ;;  %1534 = vmatprep.subr.bf16.mxu1 %v4324_v20 }
  0xc4   :  { %1351 = vmatpush2.bf16.msra.mxu0 %v4328_v21  ;;  %1535 = vmatpush2.bf16.msra.mxu1 %v4328_v21 }
  0xc5   :  { %1688 = vmatprep.subr.bf16.mxu0 %v4260_v0  ;;  %1872 = vmatprep.subr.bf16.mxu1 %v4260_v0  ;;  %v4542_v0 = vld [vmem:[#allocation8 + $0x14] ss:$8 sps:$4 sm:$0xff]  }
  0xc7   :  { %1353 = vmatmul.mubr.bf16.vlgmr.msra.gmra.mxu0 %v3656_v40  ;;  %1537 = vmatmul.mubr.bf16.vlgmr.msra.gmra.mxu1 %v3679_v41 }
  0xc8   :  { %1689 = vmatpush1.bf16.msra.mxu0 %v4262_v1  ;;  %1873 = vmatpush1.bf16.msra.mxu1 %v4262_v1  ;;  %v4546_v1 = vld [vmem:[#allocation8 + $0x10] ss:$8 sps:$4 sm:$0xff]  }
  0xc9   :  { %1690 = vmatprep.subr.bf16.mxu0 %v4266_v2  ;;  %1874 = vmatprep.subr.bf16.mxu1 %v4266_v2  ;;  %v4550_v2 = vld [vmem:[#allocation8 + $0x4] ss:$8 sps:$4 sm:$0xff]  }
  0xca   :  { %3722 = vmatprep.mubr.msk.bf16.mxu0 %vm210_vm0, %v3703_v44  ;;  %3745 = vmatprep.mubr.msk.bf16.mxu1 %vm210_vm0, %v3726_v45 }
  0xcc   :  { %1691 = vmatpush1.bf16.msra.mxu0 %v4270_v3  ;;  %1875 = vmatpush1.bf16.msra.mxu1 %v4270_v3  ;;  %v4554_v3 = vld [vmem:[#allocation8] ss:$8 sps:$4 sm:$0xff]  }
  0xcd   :  { %1692 = vmatprep.subr.bf16.mxu0 %v4274_v4  ;;  %1876 = vmatprep.subr.bf16.mxu1 %v4274_v4  ;;  %v4558_v4 = vld [vmem:[#allocation8 + $0x84] ss:$8 sps:$4 sm:$0xff]  }
  0xd0   :  { %1693 = vmatpush1.bf16.msra.mxu0 %v4278_v5  ;;  %1877 = vmatpush1.bf16.msra.mxu1 %v4278_v5  ;;  %v4562_v5 = vld [vmem:[#allocation8 + $0x80] ss:$8 sps:$4 sm:$0xff]  }
  0xd1   :  { %1694 = vmatprep.subr.bf16.mxu0 %v4282_v6  ;;  %1878 = vmatprep.subr.bf16.mxu1 %v4282_v6  ;;  %v3748_v6 = vcombine.low %v4486_v49, %v4486_v49 }
  0xd4   :  { %1695 = vmatpush1.bf16.msra.mxu0 %v4286_v7  ;;  %1879 = vmatpush1.bf16.msra.mxu1 %v4286_v7  ;;  %v3771_v7 = vcombine.low %v4488_v50, %v4488_v50 }
  0xd5   :  { %1696 = vmatprep.subr.bf16.mxu0 %v4290_v8  ;;  %1880 = vmatprep.subr.bf16.mxu1 %v4290_v8  ;;  %v4570_v8 = vld [vmem:[#allocation4 + $0x60] sm:$0xff] }
  0xd6   :  { %v3795_v11 = vcombine.high %v4570_v8, %v4570_v8 }
  0xd8   :  { %1697 = vmatpush1.bf16.msra.mxu0 %v4292_v13  ;;  %1881 = vmatpush1.bf16.msra.mxu1 %v4292_v13  ;;  %v105_v13 = vshrl.u32 %v104_v10, 7  ;;  %v4653_v10 = vld [vmem:[#allocation4 + $0x78] sm:$0xff] }
  0xd9   :  { %1698 = vmatprep.subr.bf16.mxu0 %v4294_v14  ;;  %1882 = vmatprep.subr.bf16.mxu1 %v4294_v14 }
  0xda   :  { %v4590_v14 = vsub.s32 0, %v105_v13 }
  0xdc   :  { %1699 = vmatpush1.bf16.msra.mxu0 %v4300_v15  ;;  %1883 = vmatpush1.bf16.msra.mxu1 %v4300_v15  ;;  %v102_v15 = vld [vmem:[%s4916_s2] sm:$0x3] }
  0xdd   :  { %1700 = vmatprep.subr.bf16.mxu0 %v4308_v16  ;;  %1884 = vmatprep.subr.bf16.mxu1 %v4308_v16  ;;  %v289_v16 = vld [vmem:[%s4916_s2] sm:$0x3] }
  0xe0   :  { %1701 = vmatpush1.bf16.msra.mxu0 %v4312_v17  ;;  %1885 = vmatpush1.bf16.msra.mxu1 %v4312_v17  ;;  %v4604_v17 = vsub.s32 1, %v105_v13 }
  0xe1   :  { %1702 = vmatprep.subr.bf16.mxu0 %v4316_v18  ;;  %1886 = vmatprep.subr.bf16.mxu1 %v4316_v18  ;;  %v107_v18 = vrot.slane %v102_v15, %v4590_v14 }
  0xe4   :  { %1703 = vmatpush1.bf16.msra.mxu0 %v4320_v19  ;;  %1887 = vmatpush1.bf16.msra.mxu1 %v4320_v19  ;;  %v294_v19 = vrot.slane %v289_v16, %v4590_v14 }
  0xe5   :  { %1718 = vmatprep.subr.bf16.mxu0 %v4324_v20  ;;  %1902 = vmatprep.subr.bf16.mxu1 %v4324_v20  ;;  %v111_v20 = vrot.slane %v102_v15, %v4604_v17 }
  0xe8   :  { %1719 = vmatpush2.bf16.msra.mxu0 %v4328_v21  ;;  %1903 = vmatpush2.bf16.msra.mxu1 %v4328_v21  ;;  %v298_v21 = vrot.slane %v289_v16, %v4604_v17 }
  0xe9   :  { %2056 = vmatprep.subr.bf16.mxu0 %v4484_v46  ;;  %2240 = vmatprep.subr.bf16.mxu1 %v4484_v46 }
  0xeb   :  { %1721 = vmatmul.mubr.bf16.vlgmr.msra.gmra.mxu0 %v3702_v47  ;;  %1905 = vmatmul.mubr.bf16.vlgmr.msra.gmra.mxu1 %v3725_v48  ;;  %v265_v47 = vstv %s4918_s4  ;;  %s4671_s4 = sld [smem:[#allocation10 + $0x2]] }
  0xec   :  { %2057 = vmatpush1.bf16.msra.mxu0 %v4492_v51  ;;  %2241 = vmatpush1.bf16.msra.mxu1 %v4492_v51 }
  0xed   :  { %2058 = vmatprep.subr.bf16.mxu0 %v4496_v52  ;;  %2242 = vmatprep.subr.bf16.mxu1 %v4496_v52 }
  0xee   :  { %3768 = vmatprep.mubr.msk.bf16.mxu0 %vm210_vm0, %v3749_v53  ;;  %3791 = vmatprep.mubr.msk.bf16.mxu1 %vm210_vm0, %v3772_v54  ;;  %v3794_v54 = vcombine.low %v4570_v8, %v4570_v8  ;;  %v3864_v8 = vcombine.high %v4653_v10, %v4653_v10 }
  0xf0   :  { %2059 = vmatpush1.bf16.msra.mxu0 %v4504_v55  ;;  %2243 = vmatpush1.bf16.msra.mxu1 %v4504_v55 }
  0xf1   :  { %2060 = vmatprep.subr.bf16.mxu0 %v4508_v56  ;;  %2244 = vmatprep.subr.bf16.mxu1 %v4508_v56 }
  0xf4   :  { %2061 = vmatpush1.bf16.msra.mxu0 %v4514_v57  ;;  %2245 = vmatpush1.bf16.msra.mxu1 %v4514_v57 }
  0xf5   :  { %2062 = vmatprep.subr.bf16.mxu0 %v4518_v58  ;;  %2246 = vmatprep.subr.bf16.mxu1 %v4518_v58 }
  0xf8   :  { %2063 = vmatpush1.bf16.msra.mxu0 %v4522_v59  ;;  %2247 = vmatpush1.bf16.msra.mxu1 %v4522_v59 }
  0xf9   :  { %2064 = vmatprep.subr.bf16.mxu0 %v4526_v60  ;;  %2248 = vmatprep.subr.bf16.mxu1 %v4526_v60 }
  0xfc   :  { %2065 = vmatpush1.bf16.msra.mxu0 %v4530_v61  ;;  %2249 = vmatpush1.bf16.msra.mxu1 %v4530_v61 }
  0xfd   :  { %2066 = vmatprep.subr.bf16.mxu0 %v4534_v62  ;;  %2250 = vmatprep.subr.bf16.mxu1 %v4534_v62 }
 0x100   :  { %2067 = vmatpush1.bf16.msra.mxu0 %v4538_v63  ;;  %2251 = vmatpush1.bf16.msra.mxu1 %v4538_v63 }
 0x101   :  { %2068 = vmatprep.subr.bf16.mxu0 %v4542_v0  ;;  %2252 = vmatprep.subr.bf16.mxu1 %v4542_v0 }
 0x104   :  { %2069 = vmatpush1.bf16.msra.mxu0 %v4546_v1  ;;  %2253 = vmatpush1.bf16.msra.mxu1 %v4546_v1 }
 0x105   :  { %2070 = vmatprep.subr.bf16.mxu0 %v4550_v2  ;;  %2254 = vmatprep.subr.bf16.mxu1 %v4550_v2 }
 0x108   :  { %2071 = vmatpush1.bf16.msra.mxu0 %v4554_v3  ;;  %2255 = vmatpush1.bf16.msra.mxu1 %v4554_v3 }
 0x109   :  { %2086 = vmatprep.subr.bf16.mxu0 %v4558_v4  ;;  %2270 = vmatprep.subr.bf16.mxu1 %v4558_v4 }
 0x10c   :  { %2087 = vmatpush2.bf16.msra.mxu0 %v4562_v5  ;;  %2271 = vmatpush2.bf16.msra.mxu1 %v4562_v5 }
 0x10d   :  { %2424 = vmatprep.subr.bf16.mxu0 %v4484_v46  ;;  %2608 = vmatprep.subr.bf16.mxu1 %v4484_v46 }
 0x10f   :  { %2089 = vmatmul.mubr.bf16.vlgmr.msra.gmra.mxu0 %v3748_v6  ;;  %2273 = vmatmul.mubr.bf16.vlgmr.msra.gmra.mxu1 %v3771_v7  ;;  %v3817_v6 = vcombine.low %v4572_v9, %v4572_v9  ;;  %v4651_v7 = vld [vmem:[#allocation4 + $0x70] sm:$0xff]  ;;  %v473_v9 = vld [vmem:[%s4916_s2] sm:$0x3] }
 0x110   :  { %2425 = vmatpush1.bf16.msra.mxu0 %v4492_v51  ;;  %2609 = vmatpush1.bf16.msra.mxu1 %v4492_v51  ;;  %v478_v13 = vrot.slane %v473_v9, %v4590_v14  ;;  %v482_v16 = vrot.slane %v473_v9, %v4604_v17 }
 0x111   :  { %2426 = vmatprep.subr.bf16.mxu0 %v4496_v52  ;;  %2610 = vmatprep.subr.bf16.mxu1 %v4496_v52 }
 0x112   :  { %3814 = vmatprep.mubr.msk.bf16.mxu0 %vm210_vm0, %v3795_v11  ;;  %3837 = vmatprep.mubr.msk.bf16.mxu1 %vm210_vm0, %v3818_v12  ;;  %v3841_v11 = vcombine.high %v4651_v7, %v4651_v7  ;;  %v657_v12 = vld [vmem:[%s4916_s2] sm:$0x3] }
 0x113   :  { %v662_v15 = vrot.slane %v657_v12, %v4590_v14 }
 0x114   :  { %2427 = vmatpush1.bf16.msra.mxu0 %v4504_v55  ;;  %2611 = vmatpush1.bf16.msra.mxu1 %v4504_v55 }
 0x115   :  { %2428 = vmatprep.subr.bf16.mxu0 %v4508_v56  ;;  %2612 = vmatprep.subr.bf16.mxu1 %v4508_v56 }
 0x118   :  { %2429 = vmatpush1.bf16.msra.mxu0 %v4514_v57  ;;  %2613 = vmatpush1.bf16.msra.mxu1 %v4514_v57 }
 0x119   :  { %2430 = vmatprep.subr.bf16.mxu0 %v4518_v58  ;;  %2614 = vmatprep.subr.bf16.mxu1 %v4518_v58 }
 0x11b   :  { %v248_v22 = vpop.f32.mrf.mxu0  ;;  %v434_v23 = vpop.f32.mrf.mxu1 }
 0x11c   :  { %v249_v24 = vadd.f32 %v248_v22, %v107_v18  ;;  %v435_v25 = vadd.f32 %v434_v23, %v294_v19  ;;  %2431 = vmatpush1.bf16.msra.mxu0 %v4522_v59  ;;  %2615 = vmatpush1.bf16.msra.mxu1 %v4522_v59  ;;  %v666_v18 = vrot.slane %v657_v12, %v4604_v17  ;;  %v628_v23 = vstv %s4671_s4 }
 0x11d   :  { %v250_v28 = vpop.f32.mrf.mxu0  ;;  %v436_v29 = vpop.f32.mrf.mxu1  ;;  %2432 = vmatprep.subr.bf16.mxu0 %v4526_v60  ;;  %2616 = vmatprep.subr.bf16.mxu1 %v4526_v60  ;;  %v1180_v12 = vstv %s4756_s17 }
 0x11e   :  { %v255_v30 = vmax.f32 %v249_v24, 0.0  ;;  %v441_v31 = vmax.f32 %v435_v25, 0.0  ;;  %v251_v32 = vadd.f32 %v250_v28, %v111_v20  ;;  %v437_v33 = vadd.f32 %v436_v29, %v298_v21 }
 0x11f   :  { %v252_v36 = vpop.f32.mrf.mxu0  ;;  %v438_v37 = vpop.f32.mrf.mxu1  ;;  %v812_v24 = vstv %s4681_s10  ;;  %s4894_s10 = sld [smem:[#allocation10 + $0x11]] }
 0x120   :  { %v259_v38 = vmul.f32 %v258_v26, %v255_v30  ;;  %v445_v39 = vmul.f32 %v444_v27, %v441_v31  ;;  %v256_v40 = vmax.f32 %v251_v32, 0.0  ;;  %v442_v41 = vmax.f32 %v437_v33, 0.0  ;;  %2433 = vmatpush1.bf16.msra.mxu0 %v4530_v61  ;;  %2617 = vmatpush1.bf16.msra.mxu1 %v4530_v61 }
 0x121   :  { %v253_v42 = vpop.f32.mrf.mxu0  ;;  %v439_v43 = vpop.f32.mrf.mxu1  ;;  %2434 = vmatprep.subr.bf16.mxu0 %v4534_v62  ;;  %2618 = vmatprep.subr.bf16.mxu1 %v4534_v62  ;;  %v631_v31 = vstv %s4683_s11  ;;  %v815_v32 = vstv %s4685_s12  ;;  %s4896_s11 = sld [smem:[#allocation10 + $0x22]] }
 0x122   :  { %v262_v44 = vmul.f32 %v261_v34, %v256_v40  ;;  %v448_v45 = vmul.f32 %v447_v35, %v442_v41  ;;  %s4899_s12 = sld [smem:[#allocation10 + $0x23]] }
 0x124   :  { %v263_v48 = vadd.f32 %v262_v44, %v259_v38  ;;  %v449_v49 = vadd.f32 %v448_v45, %v445_v39  ;;  %2435 = vmatpush1.bf16.msra.mxu0 %v4538_v63  ;;  %2619 = vmatpush1.bf16.msra.mxu1 %v4538_v63 }
 0x125   :  { %2436 = vmatprep.subr.bf16.mxu0 %v4542_v0  ;;  %2620 = vmatprep.subr.bf16.mxu1 %v4542_v0 }
 0x126   :  { %v266_v50 = vadd.f32 %v265_v47, %v263_v48  ;;  %v3840_v48 = vcombine.low %v4651_v7, %v4651_v7 }
 0x128   :  { %v4637_v53 = vadd.f32 %v449_v49, %v266_v50  ;;  %2437 = vmatpush1.bf16.msra.mxu0 %v4546_v1  ;;  %2621 = vmatpush1.bf16.msra.mxu1 %v4546_v1  ;;  %v3863_v49 = vcombine.low %v4653_v10, %v4653_v10  ;;  %v4726_v50 = vld [vmem:[#allocation4 + $0x80] sm:$0xff] }
 0x129   :  { %2438 = vmatprep.subr.bf16.mxu0 %v4550_v2  ;;  %2622 = vmatprep.subr.bf16.mxu1 %v4550_v2 }
 0x12c   :  { %2439 = vmatpush1.bf16.msra.mxu0 %v4554_v3  ;;  %2623 = vmatpush1.bf16.msra.mxu1 %v4554_v3 }
 0x12d   :  { %2454 = vmatprep.subr.bf16.mxu0 %v4558_v4  ;;  %2638 = vmatprep.subr.bf16.mxu1 %v4558_v4 }
 0x130   :  { %2455 = vmatpush2.bf16.msra.mxu0 %v4562_v5  ;;  %2639 = vmatpush2.bf16.msra.mxu1 %v4562_v5 }
 0x131   :  { %2792 = vmatprep.subr.bf16.mxu0 %v4484_v46  ;;  %2976 = vmatprep.subr.bf16.mxu1 %v4484_v46 }
 0x133   :  { %2457 = vmatmul.mubr.bf16.vlgmr.msra.gmra.mxu0 %v3794_v54  ;;  %2641 = vmatmul.mubr.bf16.vlgmr.msra.gmra.mxu1 %v3817_v6  ;;  %v3887_v54 = vcombine.high %v4726_v50, %v4726_v50 }
 0x134   :  { %2793 = vmatpush1.bf16.msra.mxu0 %v4492_v51  ;;  %2977 = vmatpush1.bf16.msra.mxu1 %v4492_v51 }
 0x135   :  { %2794 = vmatprep.subr.bf16.mxu0 %v4496_v52  ;;  %2978 = vmatprep.subr.bf16.mxu1 %v4496_v52 }
 0x136   :  { %3860 = vmatprep.mubr.msk.bf16.mxu0 %vm210_vm0, %v3841_v11  ;;  %3883 = vmatprep.mubr.msk.bf16.mxu1 %vm210_vm0, %v3864_v8 }
 0x138   :  { %2795 = vmatpush1.bf16.msra.mxu0 %v4504_v55  ;;  %2979 = vmatpush1.bf16.msra.mxu1 %v4504_v55 }
 0x139   :  { %2796 = vmatprep.subr.bf16.mxu0 %v4508_v56  ;;  %2980 = vmatprep.subr.bf16.mxu1 %v4508_v56 }
 0x13c   :  { %2797 = vmatpush1.bf16.msra.mxu0 %v4514_v57  ;;  %2981 = vmatpush1.bf16.msra.mxu1 %v4514_v57 }
 0x13d   :  { %2798 = vmatprep.subr.bf16.mxu0 %v4518_v58  ;;  %2982 = vmatprep.subr.bf16.mxu1 %v4518_v58 }
 0x13f   :  { %v618_v19 = vpop.f32.mrf.mxu0  ;;  %v802_v20 = vpop.f32.mrf.mxu1 }
 0x140   :  { %v619_v21 = vadd.f32 %v618_v19, %v478_v13  ;;  %v803_v22 = vadd.f32 %v802_v20, %v662_v15  ;;  %2799 = vmatpush1.bf16.msra.mxu0 %v4522_v59  ;;  %2983 = vmatpush1.bf16.msra.mxu1 %v4522_v59  ;;  %v999_v20 = vstv %s4758_s18 }
 0x141   :  { %v620_v25 = vpop.f32.mrf.mxu0  ;;  %v804_v26 = vpop.f32.mrf.mxu1  ;;  %2800 = vmatprep.subr.bf16.mxu0 %v4526_v60  ;;  %2984 = vmatprep.subr.bf16.mxu1 %v4526_v60 }
 0x142   :  { %v625_v27 = vmax.f32 %v619_v21, 0.0  ;;  %v809_v28 = vmax.f32 %v803_v22, 0.0  ;;  %v621_v29 = vadd.f32 %v620_v25, %v482_v16  ;;  %v805_v30 = vadd.f32 %v804_v26, %v666_v18 }
 0x143   :  { %v622_v33 = vpop.f32.mrf.mxu0  ;;  %v806_v34 = vpop.f32.mrf.mxu1  ;;  %v1183_v21 = vstv %s4760_s19 }
 0x144   :  { %v629_v35 = vmul.f32 %v628_v23, %v625_v27  ;;  %v813_v36 = vmul.f32 %v812_v24, %v809_v28  ;;  %v626_v37 = vmax.f32 %v621_v29, 0.0  ;;  %v810_v38 = vmax.f32 %v805_v30, 0.0  ;;  %2801 = vmatpush1.bf16.msra.mxu0 %v4530_v61  ;;  %2985 = vmatpush1.bf16.msra.mxu1 %v4530_v61 }
 0x145   :  { %v623_v39 = vpop.f32.mrf.mxu0  ;;  %v807_v40 = vpop.f32.mrf.mxu1  ;;  %2802 = vmatprep.subr.bf16.mxu0 %v4534_v62  ;;  %2986 = vmatprep.subr.bf16.mxu1 %v4534_v62 }
 0x146   :  { %v632_v41 = vmul.f32 %v631_v31, %v626_v37  ;;  %v816_v42 = vmul.f32 %v815_v32, %v810_v38  ;;  %v1364_v37 = vstv %s3677_s0  ;;  %v1548_v38 = vstv %s3700_s22 }
 0x148   :  { %v633_v43 = vadd.f32 %v632_v41, %v629_v35  ;;  %v817_v44 = vadd.f32 %v816_v42, %v813_v36  ;;  %2803 = vmatpush1.bf16.msra.mxu0 %v4538_v63  ;;  %2987 = vmatpush1.bf16.msra.mxu1 %v4538_v63 }
 0x149   :  { %2804 = vmatprep.subr.bf16.mxu0 %v4542_v0  ;;  %2988 = vmatprep.subr.bf16.mxu1 %v4542_v0 }
 0x14a   :  { %v634_v45 = vadd.f32 %v633_v43, %v4637_v53  ;;  %v4728_v53 = vld [vmem:[#allocation4 + $0x88] sm:$0xff] }
 0x14b   :  { %v3910_v6 = vcombine.high %v4728_v53, %v4728_v53 }
 0x14c   :  { %v4712_v47 = vadd.f32 %v817_v44, %v634_v45  ;;  %2805 = vmatpush1.bf16.msra.mxu0 %v4546_v1  ;;  %2989 = vmatpush1.bf16.msra.mxu1 %v4546_v1  ;;  %v1367_v45 = vstv %s3678_s23  ;;  %s3861_s23 = sld [smem:[#allocation10 + $0xe]] }
 0x14d   :  { %2806 = vmatprep.subr.bf16.mxu0 %v4550_v2  ;;  %2990 = vmatprep.subr.bf16.mxu1 %v4550_v2 }
 0x150   :  { %2807 = vmatpush1.bf16.msra.mxu0 %v4554_v3  ;;  %2991 = vmatpush1.bf16.msra.mxu1 %v4554_v3 }
 0x151   :  { %2822 = vmatprep.subr.bf16.mxu0 %v4558_v4  ;;  %3006 = vmatprep.subr.bf16.mxu1 %v4558_v4 }
 0x154   :  { %2823 = vmatpush2.bf16.msra.mxu0 %v4562_v5  ;;  %3007 = vmatpush2.bf16.msra.mxu1 %v4562_v5 }
 0x155   :  { %3160 = vmatprep.subr.bf16.mxu0 %v4484_v46  ;;  %3344 = vmatprep.subr.bf16.mxu1 %v4484_v46  ;;  %v841_v46 = vld [vmem:[%s4916_s2] sm:$0x3] }
 0x157   :  { %2825 = vmatmul.mubr.bf16.vlgmr.msra.gmra.mxu0 %v3840_v48  ;;  %3009 = vmatmul.mubr.bf16.vlgmr.msra.gmra.mxu1 %v3863_v49 }
 0x158   :  { %3161 = vmatpush1.bf16.msra.mxu0 %v4492_v51  ;;  %3345 = vmatpush1.bf16.msra.mxu1 %v4492_v51  ;;  %v1025_v51 = vld [vmem:[%s4916_s2] sm:$0x3] }
 0x159   :  { %3162 = vmatprep.subr.bf16.mxu0 %v4496_v52  ;;  %3346 = vmatprep.subr.bf16.mxu1 %v4496_v52  ;;  %v846_v52 = vrot.slane %v841_v46, %v4590_v14  ;;  %v1034_v7 = vrot.slane %v1025_v51, %v4604_v17 }
 0x15a   :  { %3906 = vmatprep.mubr.msk.bf16.mxu0 %vm210_vm0, %v3887_v54  ;;  %3929 = vmatprep.mubr.msk.bf16.mxu1 %vm210_vm0, %v3910_v6 }
 0x15c   :  { %3163 = vmatpush1.bf16.msra.mxu0 %v4504_v55  ;;  %3347 = vmatpush1.bf16.msra.mxu1 %v4504_v55  ;;  %v1030_v55 = vrot.slane %v1025_v51, %v4590_v14 }
 0x15d   :  { %3164 = vmatprep.subr.bf16.mxu0 %v4508_v56  ;;  %3348 = vmatprep.subr.bf16.mxu1 %v4508_v56  ;;  %v850_v56 = vrot.slane %v841_v46, %v4604_v17 }
 0x160   :  { %3165 = vmatpush1.bf16.msra.mxu0 %v4514_v57  ;;  %3349 = vmatpush1.bf16.msra.mxu1 %v4514_v57  ;;  %v996_v57 = vstv %s4746_s13 }
 0x161   :  { %3166 = vmatprep.subr.bf16.mxu0 %v4518_v58  ;;  %3350 = vmatprep.subr.bf16.mxu1 %v4518_v58 }
 0x163   :  { %v986_v10 = vpop.f32.mrf.mxu0  ;;  %v1170_v11 = vpop.f32.mrf.mxu1 }
 0x164   :  { %v987_v8 = vadd.f32 %v986_v10, %v846_v52  ;;  %v1171_v9 = vadd.f32 %v1170_v11, %v1030_v55  ;;  %3167 = vmatpush1.bf16.msra.mxu0 %v4522_v59  ;;  %3351 = vmatpush1.bf16.msra.mxu1 %v4522_v59 }
 0x165   :  { %v988_v13 = vpop.f32.mrf.mxu0  ;;  %v1172_v15 = vpop.f32.mrf.mxu1  ;;  %3168 = vmatprep.subr.bf16.mxu0 %v4526_v60  ;;  %3352 = vmatprep.subr.bf16.mxu1 %v4526_v60 }
 0x166   :  { %v993_v58 = vmax.f32 %v987_v8, 0.0  ;;  %v1177_v16 = vmax.f32 %v1171_v9, 0.0  ;;  %v989_v18 = vadd.f32 %v988_v13, %v850_v56  ;;  %v1173_v19 = vadd.f32 %v1172_v15, %v1034_v7  ;;  %v1577_v8 = vld [vmem:[%s4916_s2] sm:$0x3]  ;;  %v3413_v9 = vld [vmem:[#allocation11 + $0x78] sm:$0xff]  ;;  %v3412_v13 = vld [vmem:[#allocation11 + $0x70] sm:$0xff] }
 0x167   :  { %v990_v22 = vpop.f32.mrf.mxu0  ;;  %v1174_v23 = vpop.f32.mrf.mxu1  ;;  %v3411_v15 = vld [vmem:[#allocation11 + $0x68] sm:$0xff] }
 0x168   :  { %v997_v24 = vmul.f32 %v996_v57, %v993_v58  ;;  %v1181_v25 = vmul.f32 %v1180_v12, %v1177_v16  ;;  %v994_v26 = vmax.f32 %v989_v18, 0.0  ;;  %v1178_v59 = vmax.f32 %v1173_v19, 0.0  ;;  %3169 = vmatpush1.bf16.msra.mxu0 %v4530_v61  ;;  %3353 = vmatpush1.bf16.msra.mxu1 %v4530_v61  ;;  %v1761_v57 = vld [vmem:[%s4916_s2] sm:$0x3]  ;;  %v3409_v23 = vld [vmem:[#allocation11 + $0x58] sm:$0xff] }
 0x169   :  { %v991_v27 = vpop.f32.mrf.mxu0  ;;  %v1175_v28 = vpop.f32.mrf.mxu1  ;;  %3170 = vmatprep.subr.bf16.mxu0 %v4534_v62  ;;  %3354 = vmatprep.subr.bf16.mxu1 %v4534_v62  ;;  %v3886_v62 = vcombine.low %v4726_v50, %v4726_v50  ;;  %v4196_v12 = vmov 0.0   ;;  %v1582_v58 = vrot.slane %v1577_v8, %v4590_v14  ;;  %v1766_v16 = vrot.slane %v1761_v57, %v4590_v14  ;;  %v3410_v18 = vld [vmem:[#allocation11 + $0x60] sm:$0xff] }
 0x16a   :  { %v1000_v60 = vmul.f32 %v999_v20, %v994_v26  ;;  %v1184_v29 = vmul.f32 %v1183_v21, %v1178_v59  ;;  %v1586_v19 = vrot.slane %v1577_v8, %v4604_v17  ;;  %v1770_v20 = vrot.slane %v1761_v57, %v4604_v17 }
 0x16b   :  { %v1732_v26 = vstv %s4814_s27  ;;  %v1916_v59 = vstv %s4819_s29  ;;  %v2284_v8 = vstv %s3792_s14  ;;  %s3884_s27 = sld [smem:[#allocation10 + $0xf]]  ;;  %s4198_s14 = smov [#allocation12]  }
 0x16c   :  { %v1001_v30 = vadd.f32 %v1000_v60, %v997_v24  ;;  %v1185_v31 = vadd.f32 %v1184_v29, %v1181_v25  ;;  %3171 = vmatpush1.bf16.msra.mxu0 %v4538_v63  ;;  %3355 = vmatpush1.bf16.msra.mxu1 %v4538_v63  ;;  %v3909_v63 = vcombine.low %v4728_v53, %v4728_v53  ;;  %v3408_v60 = vld [vmem:[#allocation11 + $0x50] sm:$0xff] }
 0x16d   :  { %3172 = vmatprep.subr.bf16.mxu0 %v4542_v0  ;;  %3356 = vmatprep.subr.bf16.mxu1 %v4542_v0  ;;  %v1209_v0 = vld [vmem:[%s4916_s2] sm:$0x3] }
 0x16e   :  { %v1002_v61 = vadd.f32 %v1001_v30, %v4712_v47  ;;  %v1551_v47 = vstv %s3701_s24 }
 0x170   :  { %v1186_v32 = vadd.f32 %v1185_v31, %v1002_v61  ;;  %3173 = vmatpush1.bf16.msra.mxu0 %v4546_v1  ;;  %3357 = vmatpush1.bf16.msra.mxu1 %v4546_v1  ;;  %v1393_v1 = vld [vmem:[%s4916_s2] sm:$0x3] }
 0x171   :  { %3174 = vmatprep.subr.bf16.mxu0 %v4550_v2  ;;  %3358 = vmatprep.subr.bf16.mxu1 %v4550_v2  ;;  %v1214_v2 = vrot.slane %v1209_v0, %v4590_v14 }
 0x174   :  { %3175 = vmatpush1.bf16.msra.mxu0 %v4554_v3  ;;  %3359 = vmatpush1.bf16.msra.mxu1 %v4554_v3  ;;  %v1398_v3 = vrot.slane %v1393_v1, %v4590_v14 }
 0x175   :  { %3190 = vmatprep.subr.bf16.mxu0 %v4558_v4  ;;  %3374 = vmatprep.subr.bf16.mxu1 %v4558_v4  ;;  %v1218_v4 = vrot.slane %v1209_v0, %v4604_v17 }
 0x178   :  { %3191 = vmatpush2.bf16.msra.mxu0 %v4562_v5  ;;  %3375 = vmatpush2.bf16.msra.mxu1 %v4562_v5  ;;  %v1402_v5 = vrot.slane %v1393_v1, %v4604_v17  ;;  %v3407_v1 = vld [vmem:[#allocation11 + $0x48] sm:$0xff] }
 0x179   :  { %3950 = vmatprep.subr.mxu0 %v4196_v12 }
 0x17b   :  { %3193 = vmatmul.mubr.bf16.vlgmr.msra.gmra.mxu0 %v3886_v62  ;;  %3377 = vmatmul.mubr.bf16.vlgmr.msra.gmra.mxu1 %v3909_v63  ;;  %v1919_v62 = vstv %s4824_s8 }
 0x17c   :  { %3951 = vmatpush3.msra.mxu0 %v3413_v9  ;;  %3982 = vmatprep.mubr.msk.f32.mxu0 %vm4197_vm1, %v4196_v12 }
 0x17d   :  { %3952 = vmatprep.subr.mxu0 %v4196_v12 }
 0x17e   :  { %3953 = vmatpush3.msra.mxu0 %v3412_v13 }
 0x17f   :  { %3954 = vmatprep.subr.mxu0 %v4196_v12 }
 0x180   :  { %3955 = vmatpush3.msra.mxu0 %v3411_v15 }
 0x181   :  { %3956 = vmatprep.subr.mxu0 %v4196_v12 }
 0x182   :  { %3957 = vmatpush3.msra.mxu0 %v3410_v18  ;;  %v2287_v18 = vstv %s3793_s1 }
 0x183   :  { %3958 = vmatprep.subr.mxu0 %v4196_v12 }
 0x184   :  { %3959 = vmatpush3.msra.mxu0 %v3409_v23 }
 0x185   :  { %3960 = vmatprep.subr.mxu0 %v4196_v12 }
 0x186   :  { %3961 = vmatpush3.msra.mxu0 %v3408_v60 }
 0x187   :  { %v1354_v33 = vpop.f32.mrf.mxu0  ;;  %v1538_v34 = vpop.f32.mrf.mxu1  ;;  %3962 = vmatprep.subr.mxu0 %v4196_v12 }
 0x188   :  { %v1355_v35 = vadd.f32 %v1354_v33, %v1214_v2  ;;  %v1539_v36 = vadd.f32 %v1538_v34, %v1398_v3  ;;  %3963 = vmatpush3.msra.mxu0 %v3407_v1 }
 0x189   :  { %v1356_v39 = vpop.f32.mrf.mxu0  ;;  %v1540_v40 = vpop.f32.mrf.mxu1  ;;  %3964 = vmatprep.subr.mxu0 %v4196_v12 }
 0x18a   :  { %v1361_v41 = vmax.f32 %v1355_v35, 0.0  ;;  %v1545_v42 = vmax.f32 %v1539_v36, 0.0  ;;  %v1357_v43 = vadd.f32 %v1356_v39, %v1218_v4  ;;  %v1541_v44 = vadd.f32 %v1540_v40, %v1402_v5 }
 0x18b   :  { %v1358_v48 = vpop.f32.mrf.mxu0  ;;  %v1542_v49 = vpop.f32.mrf.mxu1 }
 0x18c   :  { %v1365_v50 = vmul.f32 %v1364_v37, %v1361_v41  ;;  %v1549_v53 = vmul.f32 %v1548_v38, %v1545_v42  ;;  %v1362_v54 = vmax.f32 %v1357_v43, 0.0  ;;  %v1546_v6 = vmax.f32 %v1541_v44, 0.0  ;;  %v3406_v41 = vld [vmem:[#allocation11 + $0x40] sm:$0xff]  ;;  %v3405_v42 = vld [vmem:[#allocation11 + $0x38] sm:$0xff]  ;;  %v3404_v43 = vld [vmem:[#allocation11 + $0x30] sm:$0xff] }
 0x18d   :  { %v1359_v46 = vpop.f32.mrf.mxu0  ;;  %v1543_v51 = vpop.f32.mrf.mxu1  ;;  %3965 = vmatpush3.msra.mxu0 %v3406_v41  ;;  %v3403_v44 = vld [vmem:[#allocation11 + $0x28] sm:$0xff]  ;;  %v3400_v48 = vld [vmem:[#allocation11 + $0x10] sm:$0xff]  ;;  %v2655_v41 = vstv %s3839_s20 }
 0x18e   :  { %v1368_v52 = vmul.f32 %v1367_v45, %v1362_v54  ;;  %v1552_v55 = vmul.f32 %v1551_v47, %v1546_v6  ;;  %3966 = vmatprep.subr.mxu0 %v4196_v12  ;;  %v3402_v45 = vld [vmem:[#allocation11 + $0x20] sm:$0xff]  ;;  %v3401_v47 = vld [vmem:[#allocation11 + $0x18] sm:$0xff]  ;;  %v3399_v49 = vld [vmem:[#allocation11 + $0x8] sm:$0xff] }
 0x18f   :  { %3967 = vmatpush3.msra.mxu0 %v3405_v42  ;;  %v2129_v54 = vld [vmem:[%s4916_s2] sm:$0x3] }
 0x190   :  { %v1369_v56 = vadd.f32 %v1368_v52, %v1365_v50  ;;  %v1553_v7 = vadd.f32 %v1552_v55, %v1549_v53  ;;  %3968 = vmatprep.subr.mxu0 %v4196_v12  ;;  %v3398_v50 = vld [vmem:[#allocation11] sm:$0xff]  ;;  %v2134_v46 = vrot.slane %v2129_v54, %v4590_v14  ;;  %v2138_v52 = vrot.slane %v2129_v54, %v4604_v17 }
 0x191   :  { %3969 = vmatpush3.msra.mxu0 %v3404_v43  ;;  %v1945_v53 = vld [vmem:[%s4916_s2] sm:$0x3] }
 0x192   :  { %v1370_v10 = vadd.f32 %v1369_v56, %v1186_v32  ;;  %v1735_v32 = vstv %s4822_s30  ;;  %3970 = vmatprep.subr.mxu0 %v4196_v12  ;;  %v1950_v6 = vrot.slane %v1945_v53, %v4590_v14  ;;  %v1954_v51 = vrot.slane %v1945_v53, %v4604_v17  ;;  %s4889_s30 = sld [smem:[#allocation10 + $0x10]] }
 0x193   :  { %3971 = vmatpush3.msra.mxu0 %v3403_v44 }
 0x194   :  { %v1554_v11 = vadd.f32 %v1553_v7, %v1370_v10  ;;  %3972 = vmatprep.subr.mxu0 %v4196_v12 }
 0x195   :  { %3973 = vmatpush3.msra.mxu0 %v3402_v45 }
 0x196   :  { %3974 = vmatprep.subr.mxu0 %v4196_v12 }
 0x197   :  { %3975 = vmatpush3.msra.mxu0 %v3401_v47 }
 0x198   :  { %3976 = vmatprep.subr.mxu0 %v4196_v12 }
 0x199   :  { %3977 = vmatpush3.msra.mxu0 %v3400_v48 }
 0x19a   :  { %3978 = vmatprep.subr.mxu0 %v4196_v12 }
 0x19b   :  { %3979 = vmatpush3.msra.mxu0 %v3399_v49 }
 0x19c   :  { %3980 = vmatprep.subr.mxu0 %v4196_v12 }
 0x19d   :  { %3981 = vmatpush3.msra.mxu0 %v3398_v50 }
 0x1ab   :  { %v1722_v21 = vpop.f32.mrf.mxu0  ;;  %v1906_v22 = vpop.f32.mrf.mxu1 }
 0x1ac   :  { %v1723_v24 = vadd.f32 %v1722_v21, %v1582_v58  ;;  %v1907_v25 = vadd.f32 %v1906_v22, %v1766_v16  ;;  %v2103_v16 = vstv %s3770_s15  ;;  %s3508_s15 = sshll.u32 %s4198_s14, 4  ;;  %s3509_s15 = int_to_ptr.vmem [resolvable:$true] %s3508_s15 }
 0x1ad   :  { %v1724_v27 = vpop.f32.mrf.mxu0  ;;  %v1908_v28 = vpop.f32.mrf.mxu1  ;;  %p4165_p7 = scmp.lt.s32.totalorder %s3509_s15, %s3509_s15 }
 0x1ae   :  { %v1729_v29 = vmax.f32 %v1723_v24, 0.0  ;;  %v1913_v30 = vmax.f32 %v1907_v25, 0.0  ;;  %v1725_v31 = vadd.f32 %v1724_v27, %v1586_v19  ;;  %v1909_v61 = vadd.f32 %v1908_v28, %v1770_v20 }
 0x1af   :  { %v1726_v63 = vpop.f32.mrf.mxu0  ;;  %v1910_v0 = vpop.f32.mrf.mxu1 }
 0x1b0   :  { %v1733_v2 = vmul.f32 %v1732_v26, %v1729_v29  ;;  %v1917_v3 = vmul.f32 %v1916_v59, %v1913_v30  ;;  %v1730_v4 = vmax.f32 %v1725_v31, 0.0  ;;  %v1914_v5 = vmax.f32 %v1909_v61, 0.0  ;;  %v2313_v31 = vld [vmem:[%s4916_s2] sm:$0x3] }
 0x1b1   :  { %v1727_v33 = vpop.f32.mrf.mxu0  ;;  %v1911_v34 = vpop.f32.mrf.mxu1  ;;  %v2497_v61 = vld [vmem:[%s4916_s2] sm:$0x3]  ;;  %v2322_v63 = vrot.slane %v2313_v31, %v4604_v17 }
 0x1b2   :  { %v1736_v35 = vmul.f32 %v1735_v32, %v1730_v4  ;;  %v1920_v36 = vmul.f32 %v1919_v62, %v1914_v5  ;;  %v2318_v32 = vrot.slane %v2313_v31, %v4590_v14  ;;  %v2502_v62 = vrot.slane %v2497_v61, %v4590_v14 }
 0x1b3   :  { %v2506_v0 = vrot.slane %v2497_v61, %v4604_v17  ;;  %v2468_v5 = vstv %s3815_s16  ;;  %v2652_v33 = vstv %s3838_s3 }
 0x1b4   :  { %v1737_v37 = vadd.f32 %v1736_v35, %v1733_v2  ;;  %v1921_v38 = vadd.f32 %v1920_v36, %v1917_v3 }
 0x1b6   :  { %v1738_v39 = vadd.f32 %v1737_v37, %v1554_v11  ;;  %v2100_v11 = vstv %s4849_s9 }
 0x1b8   :  { %v4841_v40 = vadd.f32 %v1921_v38, %v1738_v39 }
 0x1cf   :  { %v2090_v55 = vpop.f32.mrf.mxu0  ;;  %v2274_v56 = vpop.f32.mrf.mxu1 }
 0x1d0   :  { %v2091_v7 = vadd.f32 %v2090_v55, %v1950_v6  ;;  %v2275_v10 = vadd.f32 %v2274_v56, %v2134_v46 }
 0x1d1   :  { %v2092_v9 = vpop.f32.mrf.mxu0  ;;  %v2276_v57 = vpop.f32.mrf.mxu1 }
 0x1d2   :  { %v2097_v13 = vmax.f32 %v2091_v7, 0.0  ;;  %v2281_v12 = vmax.f32 %v2275_v10, 0.0  ;;  %v2093_v15 = vadd.f32 %v2092_v9, %v1954_v51  ;;  %v2277_v58 = vadd.f32 %v2276_v57, %v2138_v52 }
 0x1d3   :  { %v2094_v19 = vpop.f32.mrf.mxu0  ;;  %v2278_v20 = vpop.f32.mrf.mxu1 }
 0x1d4   :  { %v2101_v21 = vmul.f32 %v2100_v11, %v2097_v13  ;;  %v2285_v22 = vmul.f32 %v2284_v8, %v2281_v12  ;;  %v2098_v23 = vmax.f32 %v2093_v15, 0.0  ;;  %v2282_v24 = vmax.f32 %v2277_v58, 0.0  ;;  %v2681_v13 = vld [vmem:[%s4916_s2] sm:$0x3] }
 0x1d5   :  { %v2095_v25 = vpop.f32.mrf.mxu0  ;;  %v2279_v26 = vpop.f32.mrf.mxu1  ;;  %v2686_v12 = vrot.slane %v2681_v13, %v4590_v14  ;;  %v2865_v15 = vld [vmem:[%s4916_s2] sm:$0x3]  ;;  %v2690_v58 = vrot.slane %v2681_v13, %v4604_v17 }
 0x1d6   :  { %v2104_v59 = vmul.f32 %v2103_v16, %v2098_v23  ;;  %v2288_v27 = vmul.f32 %v2287_v18, %v2282_v24  ;;  %v2870_v16 = vrot.slane %v2865_v15, %v4590_v14  ;;  %v2874_v20 = vrot.slane %v2865_v15, %v4604_v17  ;;  %v3049_v25 = vld [vmem:[%s4916_s2] sm:$0x3] }
 0x1d7   :  { %v2836_v26 = vstv %s3861_s23 }
 0x1d8   :  { %v2105_v28 = vadd.f32 %v2104_v59, %v2101_v21  ;;  %v2289_v60 = vadd.f32 %v2288_v27, %v2285_v22  ;;  %v2839_v59 = vstv %s3862_s26  ;;  %v3233_v27 = vld [vmem:[%s4916_s2] sm:$0x3] }
 0x1da   :  { %v2106_v29 = vadd.f32 %v2105_v28, %v4841_v40  ;;  %v2471_v40 = vstv %s3816_s5 }
 0x1dc   :  { %v2290_v30 = vadd.f32 %v2289_v60, %v2106_v29  ;;  %v3020_v60 = vstv %s3884_s27  ;;  %v3054_v29 = vrot.slane %v3049_v25, %v4590_v14 }
 0x1f3   :  { %v2458_v1 = vpop.f32.mrf.mxu0  ;;  %v2642_v2 = vpop.f32.mrf.mxu1 }
 0x1f4   :  { %v2459_v3 = vadd.f32 %v2458_v1, %v2318_v32  ;;  %v2643_v4 = vadd.f32 %v2642_v2, %v2502_v62  ;;  %v3238_v32 = vrot.slane %v3233_v27, %v4590_v14  ;;  %v3023_v62 = vstv %s3885_s28 }
 0x1f5   :  { %v2460_v34 = vpop.f32.mrf.mxu0  ;;  %v2644_v35 = vpop.f32.mrf.mxu1 }
 0x1f6   :  { %v2465_v36 = vmax.f32 %v2459_v3, 0.0  ;;  %v2649_v37 = vmax.f32 %v2643_v4, 0.0  ;;  %v2461_v38 = vadd.f32 %v2460_v34, %v2322_v63  ;;  %v2645_v39 = vadd.f32 %v2644_v35, %v2506_v0 }
 0x1f7   :  { %v2462_v42 = vpop.f32.mrf.mxu0  ;;  %v2646_v43 = vpop.f32.mrf.mxu1  ;;  %v3058_v63 = vrot.slane %v3049_v25, %v4604_v17  ;;  %v3242_v0 = vrot.slane %v3233_v27, %v4604_v17 }
 0x1f8   :  { %v2469_v44 = vmul.f32 %v2468_v5, %v2465_v36  ;;  %v2653_v45 = vmul.f32 %v2652_v33, %v2649_v37  ;;  %v2466_v47 = vmax.f32 %v2461_v38, 0.0  ;;  %v2650_v48 = vmax.f32 %v2645_v39, 0.0 }
 0x1f9   :  { %v2463_v49 = vpop.f32.mrf.mxu0  ;;  %v2647_v50 = vpop.f32.mrf.mxu1  ;;  %v3207_v42 = vstv %s4896_s11  ;;  %v3391_v43 = vstv %s4899_s12 }
 0x1fa   :  { %v2472_v53 = vmul.f32 %v2471_v40, %v2466_v47  ;;  %v2656_v54 = vmul.f32 %v2655_v41, %v2650_v48  ;;  %v3204_v40 = vstv %s4889_s30  ;;  %v3388_v41 = vstv %s4894_s10 }
 0x1fc   :  { %v2473_v6 = vadd.f32 %v2472_v53, %v2469_v44  ;;  %v2657_v46 = vadd.f32 %v2656_v54, %v2653_v45 }
 0x1fe   :  { %v2474_v51 = vadd.f32 %v2473_v6, %v2290_v30 }
 0x200   :  { %v2658_v52 = vadd.f32 %v2657_v46, %v2474_v51 }
 0x217   :  { %v2826_v55 = vpop.f32.mrf.mxu0  ;;  %v3010_v56 = vpop.f32.mrf.mxu1 }
 0x218   :  { %v2827_v18 = vadd.f32 %v2826_v55, %v2686_v12  ;;  %v3011_v21 = vadd.f32 %v3010_v56, %v2870_v16 }
 0x219   :  { %v2828_v7 = vpop.f32.mrf.mxu0  ;;  %v3012_v10 = vpop.f32.mrf.mxu1 }
 0x21a   :  { %v2829_v19 = vadd.f32 %v2828_v7, %v2690_v58  ;;  %v2833_v22 = vmax.f32 %v2827_v18, 0.0  ;;  %v3013_v24 = vadd.f32 %v3012_v10, %v2874_v20  ;;  %v3017_v28 = vmax.f32 %v3011_v21, 0.0 }
 0x21b   :  { %v2830_v11 = vpop.f32.mrf.mxu0  ;;  %v3014_v8 = vpop.f32.mrf.mxu1 }
 0x21c   :  { %v2834_v23 = vmax.f32 %v2829_v19, 0.0  ;;  %v2837_v30 = vmul.f32 %v2836_v26, %v2833_v22  ;;  %v3018_v61 = vmax.f32 %v3013_v24, 0.0  ;;  %v3021_v1 = vmul.f32 %v3020_v60, %v3017_v28 }
 0x21d   :  { %v2831_v9 = vpop.f32.mrf.mxu0  ;;  %v3015_v57 = vpop.f32.mrf.mxu1 }
 0x21e   :  { %v2840_v31 = vmul.f32 %v2839_v59, %v2834_v23  ;;  %v3024_v5 = vmul.f32 %v3023_v62, %v3018_v61 }
 0x220   :  { %v2841_v4 = vadd.f32 %v2840_v31, %v2837_v30  ;;  %v3025_v47 = vadd.f32 %v3024_v5, %v3021_v1 }
 0x222   :  { %v2842_v45 = vadd.f32 %v2841_v4, %v2658_v52  ;;  %v3932_v52 = vld [vmem:[%s4920_s6] ss:$0 sm:$0xff]  ;;  %s4160_s6 = scalar_lea.vmem %s3509_s15, 128 }
 0x223   :  { %p4161_p6 = scmp.ne.s32.totalorder %s3509_s15, %s4160_s6  ;;  %p4166_p8 = scmp.lt.s32.totalorder %s4160_s6, %s4160_s6 }
 0x224   :  { %v3026_v55 = vadd.f32 %v3025_v47, %v2842_v45 }
 0x225   :  { %p4167_p9 = por %p4166_p8, %p4165_p7 }
 0x227   :  { %p4168_p10 = pnand %p4167_p9, %p4161_p6 }
 0x23b   :  { %v3194_v2 = vpop.f32.mrf.mxu0  ;;  %v3378_v3 = vpop.f32.mrf.mxu1 }
 0x23c   :  { %v3195_v33 = vadd.f32 %v3194_v2, %v3054_v29  ;;  %v3379_v34 = vadd.f32 %v3378_v3, %v3238_v32 }
 0x23d   :  { %v3196_v35 = vpop.f32.mrf.mxu0  ;;  %v3380_v36 = vpop.f32.mrf.mxu1 }
 0x23e   :  { %v3201_v37 = vmax.f32 %v3195_v33, 0.0  ;;  %v3385_v14 = vmax.f32 %v3379_v34, 0.0  ;;  %v3197_v38 = vadd.f32 %v3196_v35, %v3058_v63  ;;  %v3381_v39 = vadd.f32 %v3380_v36, %v3242_v0 }
 0x23f   :  { %v3198_v17 = vpop.f32.mrf.mxu0  ;;  %v3382_v44 = vpop.f32.mrf.mxu1 }
 0x240   :  { %v3202_v48 = vmax.f32 %v3197_v38, 0.0  ;;  %v3386_v49 = vmax.f32 %v3381_v39, 0.0  ;;  %v3205_v54 = vmul.f32 %v3204_v40, %v3201_v37  ;;  %v3389_v6 = vmul.f32 %v3388_v41, %v3385_v14 }
 0x241   :  { %v3199_v50 = vpop.f32.mrf.mxu0  ;;  %v3383_v53 = vpop.f32.mrf.mxu1 }
 0x242   :  { %v3208_v46 = vmul.f32 %v3207_v42, %v3202_v48  ;;  %v3392_v51 = vmul.f32 %v3391_v43, %v3386_v49 }
 0x244   :  { %v3209_v56 = vadd.f32 %v3208_v46, %v3205_v54  ;;  %v3393_v10 = vadd.f32 %v3392_v51, %v3389_v6 }
 0x246   :  { %v3210_v7 = vadd.f32 %v3209_v56, %v3026_v55 }
 0x248   :  { %v3394_v11 = vadd.f32 %v3393_v10, %v3210_v7 }
 0x24a   :  { %v3397_v8 = vmax.f32 %v3394_v11, 0.0 }
 0x24c   :  { %3983 = vmatmul.mubr.f32.vlgmr.msra.gmra.mxu0 %v3397_v8 }
 0x30c   :  { %v3487_v9 = vpop.f32.mrf.mxu0 }
 0x30d   :  { %v3488_v57 = vadd.f32 %v3932_v52, %v3487_v9 }
 0x30e   :  { %v3984_v13 = vpop.f32.mrf.mxu0 }
 0x30f   :  { %3491 = vmax.xlane.f32.xlu0 %v3488_v57 }
 0x398   :  { %v3492_v12 = vpop.xlane.xlu0 %3491 }
 0x399   :  { %v3493_v15 = vsub.f32 %v3488_v57, %v3492_v12 }
 0x39b   :  { %v3494_v58 = vmul.f32 1.442695, %v3493_v15 }
 0x39d   :  { %4084 = vpow2.f32 %v3494_v58 }
 0x3aa   :  { %v4085_v16 = vpop.eup %4084 }
 0x3ab   :  { %3496 = vadd.xlane.f32.xlu0 %v4085_v16 }
 0x434   :  { %v3497_v18 = vpop.xlane.xlu0 %3496 }
 0x435   :  { %4086 = vlog2.f32 %v3497_v18 }
 0x442   :  { %v4087_v19 = vpop.eup %4086 }
 0x443   :  { %v3499_v20 = vmul.f32 0.6931472, %v4087_v19 }
 0x445   :  { %v3500_v21 = vsub.f32 %v3493_v15, %v3499_v20 }
 0x447   :  { %3501 = vst [vmem:[#allocation12] sm:$0xff] %v3500_v21 }
 0x448   :  { %4171 = shalt.err (!%p4168_p10)
}
 0x449   :  { %3511 = dma.vmem_to_hbm [thread:$0]  %s3509_s15, 128, %s4921_s7, [#allocation6]  }
 0x44a   :  { %4188 = dma.done.wait [#allocation6], 128  }
 0x44b   :  { %4189 = vsyncadd [#allocation6], 4294967168 }
 0x44c   :  { %3515 = vsyncpa [#allocation5], 1 }
 0x44d   :  { %3516 = vsyncpa [#allocation9], 1 }
 0x44e   :  { %3517 = vsyncpa [#allocation6], 1 }
 0x44f   :  { %3518 = vsyncpa [#allocation7], 1 }

</bundles_post_ra>
